<compile_context>
chip_gen: v7x
topology: tpu7x:2x2x1
jax: 0.10.0
libtpu: 0.0.40
codegen_flags: <defaults>
</compile_context>

<pallas_src>
import math
import functools

import jax
import jax.numpy as jnp
import numpy as np
from jax import lax
from jax.experimental import pallas as pl
from jax.experimental.pallas import tpu as pltpu


def _mixture_kernel(x_ref, m1_ref, m2_ref, c_ref, out_ref, *,
                    n_valid, tiles_per_core, tile_n, inv_n, approx_recip):
    """Grid = (parallel cores, point tiles). One step handles a (tile_n, D) tile.

    x_ref  : (tile_n, D)  points tile (f32 or bf16), streamed
    m1_ref : (D, K)       (-0.5 / sigma)^T                       (resident)
    m2_ref : (D, K)       (mu / sigma)^T                         (resident)
    c_ref  : (1, K)       -0.5*(sum mu^2/sigma + sum log sigma + D log 2pi) + log(w)
    out_ref: (1, 1, K)    per-core partial responsibility sums (accumulated in place)
    """
    p_id = pl.program_id(0)          # parallel (core) axis
    i_id = pl.program_id(1)          # reduction over point tiles (last grid axis)

    @pl.when(i_id == 0)
    def _():
        out_ref[...] = jnp.zeros_like(out_ref)

    x = x_ref[...]                                           # (TN, D)
    # Two MXU dots, no lane-axis concat:  logp + log(w) = (x*x)@M1 + x@M2 + c
    logp = (jnp.dot(x * x, m1_ref[...], preferred_element_type=jnp.float32)
            + jnp.dot(x, m2_ref[...], preferred_element_type=jnp.float32)
            + c_ref[...])                                    # (TN, K) f32

    # NOTE: with K=4 the softmax intermediates use ~3% of the 128 lanes; acceptable while
    # the kernel is HBM-bound.  If K grows toward >=128, keep K on the lane axis in
    # multiples of 128 rather than tiling it below 128.
    shift = jnp.max(logp, axis=1, keepdims=True)             # (TN, 1)
    p = jnp.exp(logp - shift)                                # (TN, K)
    denom = jnp.sum(p, axis=1, keepdims=True)                # (TN, 1), >= 1 (max term is 1)
    r = p * pl.reciprocal(denom, approx=approx_recip)        # approx=True -> EUP vrcp

    # Zero padded / out-of-range tail rows so they do not contribute to the mean.
    # (Clamped fully-OOB blocks get start >= n_valid, so every row is masked.)
    start = (p_id * tiles_per_core + i_id) * tile_n
    row = lax.broadcasted_iota(jnp.int32, r.shape, 0)
    r = jnp.where(row + start < n_valid, r, 0.0)

    out_ref[...] += jnp.sum(r, axis=0, keepdims=True)[None]  # (1, 1, K)

    @pl.when(i_id == tiles_per_core - 1)
    def _():
        out_ref[...] *= inv_n


def mixture_forward(x, mu, sigma, weights, *,
                    tile_n=16384, num_parallel=1,
                    compute_dtype=jnp.float32, approx_reciprocal=False):
    """x: (N, D); mu, sigma: (K, D) diag-Gaussian params; weights: (K,) > 0. Returns (K,) f32.

    num_parallel: set 2 on v7x (2 TensorCores/chip); keep 1 on v5e/v6e.
    compute_dtype: jnp.bfloat16 halves x HBM traffic (relax tolerance to ~1e-3).
    """
    N, D = x.shape
    K, _ = mu.shape

    mu32 = mu.astype(jnp.float32)
    sigma32 = sigma.astype(jnp.float32)
    inv_sigma = 1.0 / sigma32

    # Fused constants:  (x*x)@M1 + x@M2 + c == logp + log(weights)
    M1 = (-0.5 * inv_sigma).T.astype(compute_dtype)                          # (D, K)
    M2 = (mu32 * inv_sigma).T.astype(compute_dtype)                          # (D, K)
    logconst = (jnp.sum(mu32 * mu32 * inv_sigma, axis=1)
                + jnp.sum(jnp.log(sigma32), axis=1)
                + D * math.log(2.0 * math.pi))                               # (K,)
    c = (-0.5 * logconst
         + jnp.log(weights.astype(jnp.float32))).reshape(1, K)               # (1, K)

    itemsize = jnp.dtype(compute_dtype).itemsize
    row_align = 16 if itemsize == 2 else 8                 # bf16 needs sublane multiple of 16
    dpad = pl.cdiv(D, 128) * 128                           # VMEM lane padding of the x tile

    # Cap x's double-buffer at ~32 MiB so large tiles fit every generation (v7x phys = 64 MiB).
    x_budget = 32 << 20
    max_tn = max(row_align,
                 (x_budget // (2 * dpad * itemsize)) // row_align * row_align)

    P = max(1, int(num_parallel))
    per_core = pl.cdiv(N, P)
    tn = min(int(tile_n), max_tn, pl.cdiv(per_core, row_align) * row_align)
    tn = max(tn, row_align)
    T = pl.cdiv(per_core, tn)                              # tiles per core (reduction axis)
    n_blocks = pl.cdiv(N, tn)                              # physically addressable x blocks
    last_block = n_blocks - 1

    # No pad copy: the kernel reads partial edge blocks directly; tail rows are masked.
    x_c = x.astype(compute_dtype)

    kernel = functools.partial(_mixture_kernel, n_valid=N, tiles_per_core=T,
                               tile_n=tn, inv_n=1.0 / N,
                               approx_recip=bool(approx_reciprocal))

    def x_index_map(p, i):
        # Clamp so a fully out-of-range logical block never generates an OOB block index.
        return (jnp.minimum(p * T + i, last_block), 0)

    # Explicit VMEM budget: 2 double-buffered x tiles (+ small constants/output) + headroom.
    vmem_limit = int(min(2 * tn * dpad * itemsize + (6 << 20), 64 << 20))

    out = pl.pallas_call(
        kernel,
        out_shape=jax.ShapeDtypeStruct((P, 1, K), jnp.float32),
        grid_spec=pltpu.PrefetchScalarGridSpec(
            num_scalar_prefetch=0,
            grid=(P, T),
            in_specs=[
                pl.BlockSpec((tn, D), x_index_map),            # x tile (streamed)
                pl.BlockSpec((D, K), lambda p, i: (0, 0)),     # M1 (resident)
                pl.BlockSpec((D, K), lambda p, i: (0, 0)),     # M2 (resident)
                pl.BlockSpec((1, K), lambda p, i: (0, 0)),     # c  (resident)
            ],
            out_specs=pl.BlockSpec((1, 1, K), lambda p, i: (p, 0, 0)),
        ),
        compiler_params=pltpu.CompilerParams(
            dimension_semantics=("parallel", "arbitrary"),
            vmem_limit_bytes=vmem_limit),
    )(x_c, M1, M2, c)

    return jnp.sum(out[:, 0, :], axis=0)                      # (K,)


def mixture_reference(x, mu, sigma, weights):
    """Pure-JAX mirror of the PyTorch forward ((K, N) layout)."""
    D = x.shape[1]
    diff = x[None, :, :] - mu[:, None, :]                               # (K, N, D)
    logp = -0.5 * (jnp.sum(diff * diff / sigma[:, None, :], axis=2)
                   + jnp.sum(jnp.log(sigma), axis=1)[:, None]
                   + D * math.log(2.0 * math.pi))                       # (K, N)
    shift = jnp.max(logp, axis=0)
    p = jnp.exp(logp - shift) * weights[:, None]
    return jnp.mean(p / jnp.sum(p, axis=0), axis=1)                     # (K,)


def _make_inputs(key, N, D, K):
    kx, kmu, ksig, kw = jax.random.split(key, 4)
    x = jax.random.normal(kx, (N, D), dtype=jnp.float32)
    mu = 0.5 * jax.random.normal(kmu, (K, D), dtype=jnp.float32)
    sigma = 0.5 + jnp.abs(jax.random.normal(ksig, (K, D), dtype=jnp.float32))  # diag var > 0
    weights = 0.5 + jax.random.uniform(kw, (K,), dtype=jnp.float32)            # mixture weights > 0
    return x, mu, sigma, weights


if __name__ == "__main__":
    key = jax.random.PRNGKey(0)
    k1, k2, k3 = jax.random.split(key, 3)

    # Test 1: small, non-tile-aligned N (exercises tail masking in a single partial block).
    x, mu, sigma, weights = _make_inputs(k1, N=300, D=16, K=4)
    out = jax.block_until_ready(mixture_forward(x, mu, sigma, weights))
    ref = jax.block_until_ready(mixture_reference(x, mu, sigma, weights))
    np.testing.assert_allclose(np.asarray(out), np.asarray(ref), rtol=1e-5, atol=1e-5)

    # Test 2: multi-tile reduction + 2-way parallel axis + partial final block (no pad copy).
    x, mu, sigma, weights = _make_inputs(k2, N=5000, D=16, K=4)
    out = jax.block_until_ready(
        mixture_forward(x, mu, sigma, weights, tile_n=512, num_parallel=2))
    ref = jax.block_until_ready(mixture_reference(x, mu, sigma, weights))
    np.testing.assert_allclose(np.asarray(out), np.asarray(ref), rtol=1e-5, atol=1e-5)

    # Test 3: tiny N with 2 cores -> second core's logical block is fully out of range
    # (index_map clamp + full row mask path).
    x, mu, sigma, weights = _make_inputs(k3, N=6, D=16, K=4)
    out = jax.block_until_ready(
        mixture_forward(x, mu, sigma, weights, tile_n=8, num_parallel=2))
    ref = jax.block_until_ready(mixture_reference(x, mu, sigma, weights))
    np.testing.assert_allclose(np.asarray(out), np.asarray(ref), rtol=1e-5, atol=1e-5)

    print("KERNEL_OK")
</pallas_src>

<mosaic_0001>
module attributes {stable_mosaic.version = 11 : i64} {
  func.func @_mixture_kernel(%arg0: i32, %arg1: i32, %arg2: memref<304x16xf32, #tpu.memory_space<vmem>>, %arg3: memref<16x4xf32, #tpu.memory_space<vmem>>, %arg4: memref<16x4xf32, #tpu.memory_space<vmem>>, %arg5: memref<1x4xf32, #tpu.memory_space<vmem>>, %arg6: memref<1x1x4xf32, #tpu.memory_space<vmem>>) attributes {dimension_semantics = [#tpu.dimension_semantics<parallel>, #tpu.dimension_semantics<arbitrary>], iteration_bounds = array<i64: 1, 1>, scalar_prefetch = 0 : i64, scratch_operands = 0 : i64, tpu.core_type = #tpu.core_type<tc>, window_params = [{transform_indices = @transform_0, window_bounds = array<i64: 304, 16>}, {pipeline_mode = #tpu.pipeline_mode<synchronous>, transform_indices = @transform_1, window_bounds = array<i64: 16, 4>}, {pipeline_mode = #tpu.pipeline_mode<synchronous>, transform_indices = @transform_2, window_bounds = array<i64: 16, 4>}, {pipeline_mode = #tpu.pipeline_mode<synchronous>, transform_indices = @transform_3, window_bounds = array<i64: 1, 4>}, {transform_indices = @transform_4, window_bounds = array<i64: 1, 1, 4>}]} {
    %c0_i32 = arith.constant 0 : i32
    %0 = arith.cmpi eq, %arg1, %c0_i32 : i32
    %1 = arith.extui %0 : i1 to i32
    %c0_i32_0 = arith.constant 0 : i32
    %2 = arith.cmpi ne, %1, %c0_i32_0 : i32
    scf.if %2 {
      %cst_21 = arith.constant 0.000000e+00 : f32
      %42 = vector.broadcast %cst_21 : f32 to vector<1x1x4xf32>
      %c0_22 = arith.constant 0 : index
      %c0_23 = arith.constant 0 : index
      %c0_24 = arith.constant 0 : index
      %43 = vector.load %arg6[%c0_22, %c0_23, %c0_24] : memref<1x1x4xf32, #tpu.memory_space<vmem>>, vector<1x1x4xf32>
      tpu.vector_store %arg6[%c0_22, %c0_23, %c0_24], %42 {strides = array<i32>} : memref<1x1x4xf32, #tpu.memory_space<vmem>>, vector<1x1x4xf32>,
    } else {
    }
    %c0 = arith.constant 0 : index
    %c0_1 = arith.constant 0 : index
    %3 = vector.load %arg2[%c0, %c0_1] : memref<304x16xf32, #tpu.memory_space<vmem>>, vector<304x16xf32>
    %4 = arith.mulf %3, %3 : vector<304x16xf32>
    %c0_2 = arith.constant 0 : index
    %c0_3 = arith.constant 0 : index
    %5 = vector.load %arg3[%c0_2, %c0_3] : memref<16x4xf32, #tpu.memory_space<vmem>>, vector<16x4xf32>
    %cst = arith.constant dense<0.000000e+00> : vector<304x4xf32>
    %6 = tpu.matmul %4, %5, %cst {dimension_numbers = #tpu.dot_dimension_numbers<[1], [0], [0], [1], [0, 0, 1, 1], [], []>} : vector<304x16xf32>, vector<16x4xf32>, vector<304x4xf32> -> vector<304x4xf32>
    %c0_4 = arith.constant 0 : index
    %c0_5 = arith.constant 0 : index
    %7 = vector.load %arg4[%c0_4, %c0_5] : memref<16x4xf32, #tpu.memory_space<vmem>>, vector<16x4xf32>
    %cst_6 = arith.constant dense<0.000000e+00> : vector<304x4xf32>
    %8 = tpu.matmul %3, %7, %cst_6 {dimension_numbers = #tpu.dot_dimension_numbers<[1], [0], [0], [1], [0, 0, 1, 1], [], []>} : vector<304x16xf32>, vector<16x4xf32>, vector<304x4xf32> -> vector<304x4xf32>
    %9 = arith.addf %6, %8 : vector<304x4xf32>
    %c0_7 = arith.constant 0 : index
    %c0_8 = arith.constant 0 : index
    %10 = vector.load %arg5[%c0_7, %c0_8] : memref<1x4xf32, #tpu.memory_space<vmem>>, vector<1x4xf32>
    %11 = vector.broadcast %10 : vector<1x4xf32> to vector<304x4xf32>
    %12 = arith.addf %9, %11 : vector<304x4xf32>
    %cst_9 = arith.constant dense<0xFF800000> : vector<304xf32>
    %13 = vector.multi_reduction <maximumf>, %12, %cst_9 [1] : vector<304x4xf32> to vector<304xf32>
    %14 = vector.shape_cast %13 : vector<304xf32> to vector<304x1xf32>
    %15 = vector.broadcast %14 : vector<304x1xf32> to vector<304x4xf32>
    %16 = arith.subf %12, %15 : vector<304x4xf32>
    %17 = math.exp %16 : vector<304x4xf32>
    %cst_10 = arith.constant dense<0.000000e+00> : vector<304xf32>
    %18 = vector.multi_reduction <add>, %17, %cst_10 [1] : vector<304x4xf32> to vector<304xf32>
    %19 = vector.shape_cast %18 : vector<304xf32> to vector<304x1xf32>
    %20 = tpu.reciprocal %19 : vector<304x1xf32> -> vector<304x1xf32>
    %21 = vector.broadcast %20 : vector<304x1xf32> to vector<304x4xf32>
    %22 = arith.mulf %17, %21 : vector<304x4xf32>
    %c1_i32 = arith.constant 1 : i32
    %23 = arith.muli %arg0, %c1_i32 : i32
    %24 = arith.addi %23, %arg1 : i32
    %c304_i32 = arith.constant 304 : i32
    %25 = arith.muli %24, %c304_i32 : i32
    %26 = tpu.iota {dimensions = array<i32: 0>} : vector<304x4xi32>
    %27 = vector.broadcast %25 : i32 to vector<304x4xi32>
    %28 = arith.addi %26, %27 : vector<304x4xi32>
    %c300_i32 = arith.constant 300 : i32
    %29 = vector.broadcast %c300_i32 : i32 to vector<304x4xi32>
    %30 = arith.cmpi slt, %28, %29 : vector<304x4xi32>
    %cst_11 = arith.constant 0.000000e+00 : f32
    %31 = vector.broadcast %cst_11 : f32 to vector<304x4xf32>
    %32 = arith.select %30, %22, %31 : vector<304x4xi1>, vector<304x4xf32>
    %c0_12 = arith.constant 0 : index
    %c0_13 = arith.constant 0 : index
    %c0_14 = arith.constant 0 : index
    %33 = vector.load %arg6[%c0_12, %c0_13, %c0_14] : memref<1x1x4xf32, #tpu.memory_space<vmem>>, vector<1x1x4xf32>
    %cst_15 = arith.constant dense<0.000000e+00> : vector<4xf32>
    %34 = vector.multi_reduction <add>, %32, %cst_15 [0] : vector<304x4xf32> to vector<4xf32>
    %35 = vector.shape_cast %34 : vector<4xf32> to vector<1x4xf32>
    %36 = vector.shape_cast %35 : vector<1x4xf32> to vector<1x1x4xf32>
    %37 = arith.addf %33, %36 : vector<1x1x4xf32>
    %c0_16 = arith.constant 0 : index
    %c0_17 = arith.constant 0 : index
    %c0_18 = arith.constant 0 : index
    %38 = vector.load %arg6[%c0_16, %c0_17, %c0_18] : memref<1x1x4xf32, #tpu.memory_space<vmem>>, vector<1x1x4xf32>
    tpu.vector_store %arg6[%c0_16, %c0_17, %c0_18], %37 {strides = array<i32>} : memref<1x1x4xf32, #tpu.memory_space<vmem>>, vector<1x1x4xf32>,
    %c0_i32_19 = arith.constant 0 : i32
    %39 = arith.cmpi eq, %arg1, %c0_i32_19 : i32
    %40 = arith.extui %39 : i1 to i32
    %c0_i32_20 = arith.constant 0 : i32
    %41 = arith.cmpi ne, %40, %c0_i32_20 : i32
    scf.if %41 {
      %c0_21 = arith.constant 0 : index
      %c0_22 = arith.constant 0 : index
      %c0_23 = arith.constant 0 : index
      %42 = vector.load %arg6[%c0_21, %c0_22, %c0_23] : memref<1x1x4xf32, #tpu.memory_space<vmem>>, vector<1x1x4xf32>
      %cst_24 = arith.constant 0.00333333341 : f32
      %43 = vector.broadcast %cst_24 : f32 to vector<1x1x4xf32>
      %44 = arith.mulf %42, %43 : vector<1x1x4xf32>
      %c0_25 = arith.constant 0 : index
      %c0_26 = arith.constant 0 : index
      %c0_27 = arith.constant 0 : index
      %45 = vector.load %arg6[%c0_25, %c0_26, %c0_27] : memref<1x1x4xf32, #tpu.memory_space<vmem>>, vector<1x1x4xf32>
      tpu.vector_store %arg6[%c0_25, %c0_26, %c0_27], %44 {strides = array<i32>} : memref<1x1x4xf32, #tpu.memory_space<vmem>>, vector<1x1x4xf32>,
    } else {
    }
    return
  }
  func.func @transform_0(%arg0: i32, %arg1: i32) -> (i32, i32) {
    %c1_i32 = arith.constant 1 : i32
    %0 = arith.muli %arg0, %c1_i32 : i32
    %1 = arith.addi %0, %arg1 : i32
    %c0_i32 = arith.constant 0 : i32
    %2 = arith.minsi %1, %c0_i32 : i32
    %c0_i32_0 = arith.constant 0 : i32
    %c0_i32_1 = arith.constant 0 : i32
    return %2, %c0_i32_0 : i32, i32
  }
  func.func @transform_1(%arg0: i32, %arg1: i32) -> (i32, i32) {
    %c0_i32 = arith.constant 0 : i32
    %c0_i32_0 = arith.constant 0 : i32
    %c0_i32_1 = arith.constant 0 : i32
    return %c0_i32, %c0_i32_0 : i32, i32
  }
  func.func @transform_2(%arg0: i32, %arg1: i32) -> (i32, i32) {
    %c0_i32 = arith.constant 0 : i32
    %c0_i32_0 = arith.constant 0 : i32
    %c0_i32_1 = arith.constant 0 : i32
    return %c0_i32, %c0_i32_0 : i32, i32
  }
  func.func @transform_3(%arg0: i32, %arg1: i32) -> (i32, i32) {
    %c0_i32 = arith.constant 0 : i32
    %c0_i32_0 = arith.constant 0 : i32
    %c0_i32_1 = arith.constant 0 : i32
    return %c0_i32, %c0_i32_0 : i32, i32
  }
  func.func @transform_4(%arg0: i32, %arg1: i32) -> (i32, i32, i32) {
    %c0_i32 = arith.constant 0 : i32
    %c0_i32_0 = arith.constant 0 : i32
    %c0_i32_1 = arith.constant 0 : i32
    return %arg0, %c0_i32, %c0_i32_0 : i32, i32, i32
  }
}

</mosaic_0001>

<bundles_post_ra>
// kernel: tpu_custom_call.1
= control target key start
LH: loop header
LB: loop body
LE: loop exit
PB: predicated region body
PF: predicated region fallthrough
CT: control target
= control target key end

     0   :  { %vm136_vm0 = vcmask 130048   ;;  %s2814_s0 = inlined_call_operand.vmem [shape: f32[300,16], index: 0, kind: input, shape index: {}]   ;;  %s2815_s1 = inlined_call_operand.vmem [shape: f32[16,4], index: 1, kind: input, shape index: {}]   ;;  %s2816_s2 = inlined_call_operand.vmem [shape: f32[16,4], index: 2, kind: input, shape index: {}]   ;;  %s2817_s3 = inlined_call_operand.vmem [shape: f32[1,4], index: 3, kind: input, shape index: {}]   ;;  %s2818_s4 = inlined_call_operand.hbm [shape: f32[1,1,4], index: 4, kind: output, shape index: {}]  }
   0x1   :  { %v134_v0 = vld [vmem:[%s2816_s2] sm:$0xff]  ;;  %v135_v1 = vld [vmem:[%s2816_s2 + $0x8] sm:$0xff]  ;;  %v58_v9 = vld [vmem:[%s2814_s0 + $0x10] sm:$0xff] }
   0x2   :  { %v132_v2 = vld [vmem:[%s2815_s1] sm:$0xff]  ;;  %v1885_v3 = vpack.c.bf16 %v135_v1, %v134_v0  ;;  %v133_v4 = vld [vmem:[%s2815_s1 + $0x8] sm:$0xff]  ;;  %v96_v11 = vmul.f32 %v58_v9, %v58_v9  ;;  %v59_v12 = vld [vmem:[%s2814_s0 + $0x18] sm:$0xff] }
   0x3   :  { %v56_v5 = vld [vmem:[%s2814_s0] sm:$0xff]  ;;  %v57_v6 = vld [vmem:[%s2814_s0 + $0x8] sm:$0xff]  ;;  %v1889_v7 = vpack.c.bf16 %v133_v4, %v132_v2  ;;  %v97_v14 = vmul.f32 %v59_v12, %v59_v12  ;;  %v62_v17 = vld [vmem:[%s2814_s0 + $0x30] sm:$0xff] }
   0x4   :  { %1767 = vmatprep.mubr.msk.f32.mxu1 %vm136_vm0, %v56_v5  ;;  %v94_v8 = vmul.f32 %v56_v5, %v56_v5  ;;  %1886 = vmatprep.subr.bf16.mxu1 %v1885_v3  ;;  %v95_v10 = vmul.f32 %v57_v6, %v57_v6  ;;  %v60_v13 = vld [vmem:[%s2814_s0 + $0x20] sm:$0xff]  ;;  %v61_v16 = vld [vmem:[%s2814_s0 + $0x28] sm:$0xff]  ;;  %v100_v19 = vmul.f32 %v62_v17, %v62_v17  ;;  %v63_v20 = vld [vmem:[%s2814_s0 + $0x38] sm:$0xff] }
   0x5   :  { %1890 = vmatprep.subr.bf16.mxu0 %v1889_v7  ;;  %1888 = vmatpush3.bf16.msra.mxu1 %v1885_v3  ;;  %v98_v15 = vmul.f32 %v60_v13, %v60_v13  ;;  %v99_v18 = vmul.f32 %v61_v16, %v61_v16  ;;  %v64_v21 = vld [vmem:[%s2814_s0 + $0x40] sm:$0xff] }
   0x6   :  { %1892 = vmatpush3.bf16.msra.mxu0 %v1889_v7  ;;  %1828 = vmatprep.mubr.msk.f32.mxu0 %vm136_vm0, %v94_v8 }
   0x8   :  { %1768 = vmatmul.mubr.msk.f32.vlgmr.msra.gmra.mrb[0].mxu1 %vm136_vm0, %v57_v6 }
   0x9   :  { %1829 = vmatmul.mubr.msk.f32.vlgmr.msra.gmra.mrb[0].mxu0 %vm136_vm0, %v95_v10  ;;  %1770 = vmatprep.mubr.msk.f32.mxu1 %vm136_vm0, %v58_v9 }
   0xa   :  { %1831 = vmatprep.mubr.msk.f32.mxu0 %vm136_vm0, %v96_v11 }
   0xc   :  { %1771 = vmatmul.mubr.msk.f32.gmra.mrb[2].mxu1 %vm136_vm0, %v59_v12 }
   0xd   :  { %1832 = vmatmul.mubr.msk.f32.gmra.mrb[2].mxu0 %vm136_vm0, %v97_v14  ;;  %1773 = vmatprep.mubr.msk.f32.mxu1 %vm136_vm0, %v60_v13 }
   0xe   :  { %1834 = vmatprep.mubr.msk.f32.mxu0 %vm136_vm0, %v98_v15 }
   0xf   :  { %9 = vsyncpa [#allocation3], 0  ;;  %v101_v22 = vmul.f32 %v63_v20, %v63_v20  ;;  %v102_v23 = vmul.f32 %v64_v21, %v64_v21  ;;  %v65_v24 = vld [vmem:[%s2814_s0 + $0x48] sm:$0xff]  ;;  %v66_v25 = vld [vmem:[%s2814_s0 + $0x50] sm:$0xff]  ;;  %vm920_vm1 = vcmask 31744   ;;  %vm54_vm2 = vcmask 24576  }
  0x10   :  { %1774 = vmatmul.mubr.msk.f32.gmra.mrb[4].mxu1 %vm136_vm0, %v61_v16  ;;  %v103_v26 = vmul.f32 %v65_v24, %v65_v24  ;;  %v104_v27 = vmul.f32 %v66_v25, %v66_v25  ;;  %v67_v28 = vld [vmem:[%s2814_s0 + $0x58] sm:$0xff]  ;;  %v68_v29 = vld [vmem:[%s2814_s0 + $0x60] sm:$0xff]  ;;  %v69_v32 = vld [vmem:[%s2814_s0 + $0x68] sm:$0xff] }
  0x11   :  { %1835 = vmatmul.mubr.msk.f32.gmra.mrb[4].mxu0 %vm136_vm0, %v99_v18  ;;  %1776 = vmatprep.mubr.msk.f32.mxu1 %vm136_vm0, %v62_v17  ;;  %v105_v30 = vmul.f32 %v67_v28, %v67_v28  ;;  %v106_v31 = vmul.f32 %v68_v29, %v68_v29  ;;  %v70_v33 = vld [vmem:[%s2814_s0 + $0x70] sm:$0xff]  ;;  %v107_v34 = vmul.f32 %v69_v32, %v69_v32  ;;  %v71_v36 = vld [vmem:[%s2814_s0 + $0x78] sm:$0xff]  ;;  %v72_v37 = vld [vmem:[%s2814_s0 + $0x80] sm:$0xff] }
  0x12   :  { %1837 = vmatprep.mubr.msk.f32.mxu0 %vm136_vm0, %v100_v19  ;;  %v108_v35 = vmul.f32 %v70_v33, %v70_v33  ;;  %v109_v38 = vmul.f32 %v71_v36, %v71_v36  ;;  %v110_v39 = vmul.f32 %v72_v37, %v72_v37  ;;  %v73_v40 = vld [vmem:[%s2814_s0 + $0x88] sm:$0xff]  ;;  %v74_v41 = vld [vmem:[%s2814_s0 + $0x90] sm:$0xff]  ;;  %v75_v44 = vld [vmem:[%s2814_s0 + $0x98] sm:$0xff] }
  0x13   :  { %v111_v42 = vmul.f32 %v73_v40, %v73_v40  ;;  %v112_v43 = vmul.f32 %v74_v41, %v74_v41  ;;  %v76_v45 = vld [vmem:[%s2814_s0 + $0xa0] sm:$0xff]  ;;  %v113_v46 = vmul.f32 %v75_v44, %v75_v44  ;;  %v77_v48 = vld [vmem:[%s2814_s0 + $0xa8] sm:$0xff]  ;;  %v78_v49 = vld [vmem:[%s2814_s0 + $0xb0] sm:$0xff] }
  0x14   :  { %1777 = vmatmul.mubr.msk.f32.gmra.mrb[6].mxu1 %vm136_vm0, %v63_v20  ;;  %v114_v47 = vmul.f32 %v76_v45, %v76_v45  ;;  %v115_v50 = vmul.f32 %v77_v48, %v77_v48  ;;  %v116_v51 = vmul.f32 %v78_v49, %v78_v49  ;;  %v79_v52 = vld [vmem:[%s2814_s0 + $0xb8] sm:$0xff]  ;;  %v80_v53 = vld [vmem:[%s2814_s0 + $0xc0] sm:$0xff]  ;;  %v81_v56 = vld [vmem:[%s2814_s0 + $0xc8] sm:$0xff] }
  0x15   :  { %1838 = vmatmul.mubr.msk.f32.gmra.mrb[6].mxu0 %vm136_vm0, %v101_v22  ;;  %1779 = vmatprep.mubr.msk.f32.mxu1 %vm136_vm0, %v64_v21  ;;  %v117_v54 = vmul.f32 %v79_v52, %v79_v52  ;;  %v118_v55 = vmul.f32 %v80_v53, %v80_v53  ;;  %v82_v57 = vld [vmem:[%s2814_s0 + $0xd0] sm:$0xff]  ;;  %v119_v58 = vmul.f32 %v81_v56, %v81_v56  ;;  %v83_v60 = vld [vmem:[%s2814_s0 + $0xd8] sm:$0xff]  ;;  %v84_v61 = vld [vmem:[%s2814_s0 + $0xe0] sm:$0xff] }
  0x16   :  { %1840 = vmatprep.mubr.msk.f32.mxu0 %vm136_vm0, %v102_v23  ;;  %v120_v59 = vmul.f32 %v82_v57, %v82_v57  ;;  %v121_v62 = vmul.f32 %v83_v60, %v83_v60  ;;  %v122_v63 = vmul.f32 %v84_v61, %v84_v61  ;;  %v85_v0 = vld [vmem:[%s2814_s0 + $0xe8] sm:$0xff]  ;;  %v86_v1 = vld [vmem:[%s2814_s0 + $0xf0] sm:$0xff]  ;;  %v87_v4 = vld [vmem:[%s2814_s0 + $0xf8] sm:$0xff] }
  0x17   :  { %v123_v2 = vmul.f32 %v85_v0, %v85_v0  ;;  %v124_v3 = vmul.f32 %v86_v1, %v86_v1  ;;  %v88_v5 = vld [vmem:[%s2814_s0 + $0x100] sm:$0xff]  ;;  %v125_v6 = vmul.f32 %v87_v4, %v87_v4  ;;  %v89_v8 = vld [vmem:[%s2814_s0 + $0x108] sm:$0xff]  ;;  %v90_v9 = vld [vmem:[%s2814_s0 + $0x110] sm:$0xff] }
  0x18   :  { %1780 = vmatmul.mubr.msk.f32.gmra.mrb[8].mxu1 %vm136_vm0, %v65_v24  ;;  %v126_v7 = vmul.f32 %v88_v5, %v88_v5  ;;  %v127_v10 = vmul.f32 %v89_v8, %v89_v8  ;;  %v128_v11 = vmul.f32 %v90_v9, %v90_v9  ;;  %v91_v12 = vld [vmem:[%s2814_s0 + $0x118] sm:$0xff]  ;;  %v92_v13 = vld [vmem:[%s2814_s0 + $0x120] sm:$0xff]  ;;  %v93_v16 = vld [vmem:[%s2814_s0 + $0x128] sm:$0xff] }
  0x19   :  { %1841 = vmatmul.mubr.msk.f32.gmra.mrb[8].mxu0 %vm136_vm0, %v103_v26  ;;  %1782 = vmatprep.mubr.msk.f32.mxu1 %vm136_vm0, %v66_v25  ;;  %v129_v14 = vmul.f32 %v91_v12, %v91_v12  ;;  %v130_v15 = vmul.f32 %v92_v13, %v92_v13  ;;  %v131_v17 = vmul.f32 %v93_v16, %v93_v16  ;;  %v2341_v23 = vld [vmem:[%s2817_s3] ss:$0 sm:$0xff]  ;;  %s2110_s3 = smov [#allocation2]  }
  0x1a   :  { %1843 = vmatprep.mubr.msk.f32.mxu0 %vm136_vm0, %v104_v27  ;;  %s1592_s16 = sshll.u32 %s2110_s3, 4  ;;  %s1593_s16 = int_to_ptr.vmem [resolvable:$true] %s1592_s16 }
  0x1b   :  { %s2085_s17 = scalar_lea.vmem %s1593_s16, 16  ;;  %s2089_s18 = scalar_lea.vmem %s1593_s16, 32 }
  0x1c   :  { %1783 = vmatmul.mubr.msk.f32.gmra.mrb[10].mxu1 %vm136_vm0, %v67_v28  ;;  %p2086_p0 = scmp.ne.s32.totalorder %s1593_s16, %s2085_s17  ;;  %p2090_p1 = scmp.lt.s32.totalorder %s1593_s16, %s1593_s16 }
  0x1d   :  { %1844 = vmatmul.mubr.msk.f32.gmra.mrb[10].mxu0 %vm136_vm0, %v105_v30  ;;  %1785 = vmatprep.mubr.msk.f32.mxu1 %vm136_vm0, %v68_v29  ;;  %p2091_p2 = scmp.lt.s32.totalorder %s2089_s18, %s2085_s17 }
  0x1e   :  { %1846 = vmatprep.mubr.msk.f32.mxu0 %vm136_vm0, %v106_v31 }
  0x1f   :  { %p2092_p3 = por %p2091_p2, %p2090_p1 }
  0x20   :  { %1786 = vmatmul.mubr.msk.f32.gmra.mrb[12].mxu1 %vm136_vm0, %v69_v32 }
  0x21   :  { %1847 = vmatmul.mubr.msk.f32.gmra.mrb[12].mxu0 %vm136_vm0, %v107_v34  ;;  %1788 = vmatprep.mubr.msk.f32.mxu1 %vm136_vm0, %v70_v33  ;;  %p2093_p4 = pnand %p2092_p3, %p2086_p0 }
  0x22   :  { %1849 = vmatprep.mubr.msk.f32.mxu0 %vm136_vm0, %v108_v35 }
  0x24   :  { %1789 = vmatmul.mubr.msk.f32.gmra.mrb[14].mxu1 %vm136_vm0, %v71_v36 }
  0x25   :  { %1850 = vmatmul.mubr.msk.f32.gmra.mrb[14].mxu0 %vm136_vm0, %v109_v38  ;;  %1791 = vmatprep.mubr.msk.f32.mxu1 %vm136_vm0, %v72_v37 }
  0x26   :  { %1852 = vmatprep.mubr.msk.f32.mxu0 %vm136_vm0, %v110_v39 }
  0x28   :  { %1792 = vmatmul.mubr.msk.f32.gmra.mrb[16].mxu1 %vm136_vm0, %v73_v40 }
  0x29   :  { %1853 = vmatmul.mubr.msk.f32.gmra.mrb[16].mxu0 %vm136_vm0, %v111_v42  ;;  %1794 = vmatprep.mubr.msk.f32.mxu1 %vm136_vm0, %v74_v41 }
  0x2a   :  { %1855 = vmatprep.mubr.msk.f32.mxu0 %vm136_vm0, %v112_v43 }
  0x2c   :  { %1795 = vmatmul.mubr.msk.f32.gmra.mrb[18].mxu1 %vm136_vm0, %v75_v44 }
  0x2d   :  { %1856 = vmatmul.mubr.msk.f32.gmra.mrb[18].mxu0 %vm136_vm0, %v113_v46  ;;  %1797 = vmatprep.mubr.msk.f32.mxu1 %vm136_vm0, %v76_v45 }
  0x2e   :  { %1858 = vmatprep.mubr.msk.f32.mxu0 %vm136_vm0, %v114_v47 }
  0x30   :  { %1798 = vmatmul.mubr.msk.f32.gmra.mrb[20].mxu1 %vm136_vm0, %v77_v48 }
  0x31   :  { %1859 = vmatmul.mubr.msk.f32.gmra.mrb[20].mxu0 %vm136_vm0, %v115_v50  ;;  %1800 = vmatprep.mubr.msk.f32.mxu1 %vm136_vm0, %v78_v49 }
  0x32   :  { %1861 = vmatprep.mubr.msk.f32.mxu0 %vm136_vm0, %v116_v51 }
  0x34   :  { %1801 = vmatmul.mubr.msk.f32.gmra.mrb[22].mxu1 %vm136_vm0, %v79_v52 }
  0x35   :  { %1862 = vmatmul.mubr.msk.f32.gmra.mrb[22].mxu0 %vm136_vm0, %v117_v54  ;;  %1803 = vmatprep.mubr.msk.f32.mxu1 %vm136_vm0, %v80_v53 }
  0x36   :  { %1864 = vmatprep.mubr.msk.f32.mxu0 %vm136_vm0, %v118_v55 }
  0x38   :  { %1804 = vmatmul.mubr.msk.f32.gmra.mrb[24].mxu1 %vm136_vm0, %v81_v56 }
  0x39   :  { %1865 = vmatmul.mubr.msk.f32.gmra.mrb[24].mxu0 %vm136_vm0, %v119_v58  ;;  %1806 = vmatprep.mubr.msk.f32.mxu1 %vm136_vm0, %v82_v57 }
  0x3a   :  { %1867 = vmatprep.mubr.msk.f32.mxu0 %vm136_vm0, %v120_v59 }
  0x3c   :  { %1807 = vmatmul.mubr.msk.f32.gmra.mrb[26].mxu1 %vm136_vm0, %v83_v60 }
  0x3d   :  { %1868 = vmatmul.mubr.msk.f32.gmra.mrb[26].mxu0 %vm136_vm0, %v121_v62  ;;  %1809 = vmatprep.mubr.msk.f32.mxu1 %vm136_vm0, %v84_v61 }
  0x3e   :  { %1870 = vmatprep.mubr.msk.f32.mxu0 %vm136_vm0, %v122_v63 }
  0x40   :  { %1810 = vmatmul.mubr.msk.f32.gmra.mrb[28].mxu1 %vm136_vm0, %v85_v0 }
  0x41   :  { %1871 = vmatmul.mubr.msk.f32.gmra.mrb[28].mxu0 %vm136_vm0, %v123_v2  ;;  %1812 = vmatprep.mubr.msk.f32.mxu1 %vm136_vm0, %v86_v1 }
  0x42   :  { %1873 = vmatprep.mubr.msk.f32.mxu0 %vm136_vm0, %v124_v3 }
  0x44   :  { %1813 = vmatmul.mubr.msk.f32.gmra.mrb[30].mxu1 %vm136_vm0, %v87_v4 }
  0x45   :  { %1874 = vmatmul.mubr.msk.f32.gmra.mrb[30].mxu0 %vm136_vm0, %v125_v6  ;;  %1815 = vmatprep.mubr.msk.f32.mxu1 %vm136_vm0, %v88_v5 }
  0x46   :  { %1876 = vmatprep.mubr.msk.f32.mxu0 %vm136_vm0, %v126_v7 }
  0x48   :  { %1816 = vmatmul.mubr.msk.f32.gmra.mrb[32].mxu1 %vm136_vm0, %v89_v8 }
  0x49   :  { %1877 = vmatmul.mubr.msk.f32.gmra.mrb[32].mxu0 %vm136_vm0, %v127_v10  ;;  %1818 = vmatprep.mubr.msk.f32.mxu1 %vm136_vm0, %v90_v9 }
  0x4a   :  { %1879 = vmatprep.mubr.msk.f32.mxu0 %vm136_vm0, %v128_v11 }
  0x4c   :  { %1819 = vmatmul.mubr.msk.f32.gmra.mrb[34].mxu1 %vm136_vm0, %v91_v12 }
  0x4d   :  { %1880 = vmatmul.mubr.msk.f32.gmra.mrb[34].mxu0 %vm136_vm0, %v129_v14  ;;  %1821 = vmatprep.mubr.msk.f32.mxu1 %vm136_vm0, %v92_v13 }
  0x4e   :  { %1882 = vmatprep.mubr.msk.f32.mxu0 %vm136_vm0, %v130_v15 }
  0x50   :  { %1822 = vmatmul.mubr.msk.f32.gmra.mrb[36].mxu1 %vm136_vm0, %v93_v16 }
  0x51   :  { %1883 = vmatmul.mubr.msk.f32.gmra.mrb[36].mxu0 %vm136_vm0, %v131_v17 }
  0xdb   :  { %v1769_v18 = vpop.f32.mrb[0].mxu1 }
  0xdc   :  { %v1830_v19 = vpop.f32.mrb[0].mxu0  ;;  %v317_v20 = vpop.f32.mrb[1].mxu1 }
  0xdd   :  { %v692_v21 = vadd.f32 %v1830_v19, %v1769_v18  ;;  %v686_v22 = vpop.f32.mrb[1].mxu0 }
  0xde   :  { %v687_v24 = vadd.f32 %v686_v22, %v317_v20 }
  0xdf   :  { %v1772_v25 = vpop.f32.mrb[2].mxu1  ;;  %v2349_v33 = vadd.f32 %v2341_v23, %v692_v21 }
  0xe0   :  { %v1833_v26 = vpop.f32.mrb[2].mxu0  ;;  %v327_v27 = vpop.f32.mrb[3].mxu1  ;;  %v2344_v28 = vadd.f32 %v2341_v23, %v687_v24 }
  0xe1   :  { %v702_v29 = vadd.f32 %v1833_v26, %v1772_v25  ;;  %v696_v30 = vpop.f32.mrb[3].mxu0  ;;  %v924_v42 = vsel %vm920_vm1, %v2349_v33, -inf }
  0xe2   :  { %v697_v31 = vadd.f32 %v696_v30, %v327_v27  ;;  %v921_v32 = vsel %vm920_vm1, %v2344_v28, -inf }
  0xe3   :  { %922 = vmax.xlane.f32.xlu0 %v921_v32  ;;  %v1775_v34 = vpop.f32.mrb[4].mxu1  ;;  %v2359_v43 = vadd.f32 %v2341_v23, %v702_v29 }
  0xe4   :  { %v1836_v35 = vpop.f32.mrb[4].mxu0  ;;  %v337_v36 = vpop.f32.mrb[5].mxu1  ;;  %v2352_v37 = vadd.f32 %v2341_v23, %v697_v31 }
  0xe5   :  { %v712_v38 = vadd.f32 %v1836_v35, %v1775_v34  ;;  %v706_v39 = vpop.f32.mrb[5].mxu0  ;;  %v930_v51 = vsel %vm920_vm1, %v2359_v43, -inf }
  0xe6   :  { %v707_v40 = vadd.f32 %v706_v39, %v337_v36  ;;  %v927_v41 = vsel %vm920_vm1, %v2352_v37, -inf }
  0xe7   :  { %928 = vmax.xlane.f32.xlu1 %v927_v41  ;;  %925 = vmax.xlane.f32.xlu0 %v924_v42  ;;  %v1778_v44 = vpop.f32.mrb[6].mxu1  ;;  %v2369_v53 = vadd.f32 %v2341_v23, %v712_v38 }
  0xe8   :  { %v1839_v45 = vpop.f32.mrb[6].mxu0  ;;  %v347_v46 = vpop.f32.mrb[7].mxu1  ;;  %v2362_v47 = vadd.f32 %v2341_v23, %v707_v40 }
  0xe9   :  { %v722_v48 = vadd.f32 %v1839_v45, %v1778_v44  ;;  %v716_v49 = vpop.f32.mrb[7].mxu0  ;;  %v936_v61 = vsel %vm920_vm1, %v2369_v53, -inf }
  0xea   :  { %v717_v50 = vadd.f32 %v716_v49, %v347_v46  ;;  %v933_v52 = vsel %vm920_vm1, %v2362_v47, -inf }
  0xeb   :  { %931 = vmax.xlane.f32.xlu1 %v930_v51  ;;  %934 = vmax.xlane.f32.xlu0 %v933_v52  ;;  %v1781_v54 = vpop.f32.mrb[8].mxu1  ;;  %v2379_v63 = vadd.f32 %v2341_v23, %v722_v48 }
  0xec   :  { %v1842_v55 = vpop.f32.mrb[8].mxu0  ;;  %v357_v56 = vpop.f32.mrb[9].mxu1  ;;  %v2372_v57 = vadd.f32 %v2341_v23, %v717_v50 }
  0xed   :  { %v732_v58 = vadd.f32 %v1842_v55, %v1781_v54  ;;  %v726_v59 = vpop.f32.mrb[9].mxu0  ;;  %v942_v7 = vsel %vm920_vm1, %v2379_v63, -inf }
  0xee   :  { %v727_v60 = vadd.f32 %v726_v59, %v357_v56  ;;  %v939_v62 = vsel %vm920_vm1, %v2372_v57, -inf }
  0xef   :  { %937 = vmax.xlane.f32.xlu1 %v936_v61  ;;  %940 = vmax.xlane.f32.xlu0 %v939_v62  ;;  %v1784_v0 = vpop.f32.mrb[10].mxu1  ;;  %v2389_v9 = vadd.f32 %v2341_v23, %v732_v58 }
  0xf0   :  { %v1845_v1 = vpop.f32.mrb[10].mxu0  ;;  %v367_v2 = vpop.f32.mrb[11].mxu1  ;;  %v2382_v3 = vadd.f32 %v2341_v23, %v727_v60 }
  0xf1   :  { %v742_v4 = vadd.f32 %v1845_v1, %v1784_v0  ;;  %v736_v5 = vpop.f32.mrb[11].mxu0  ;;  %v948_v17 = vsel %vm920_vm1, %v2389_v9, -inf }
  0xf2   :  { %v737_v6 = vadd.f32 %v736_v5, %v367_v2  ;;  %v945_v8 = vsel %vm920_vm1, %v2382_v3, -inf }
  0xf3   :  { %943 = vmax.xlane.f32.xlu1 %v942_v7  ;;  %946 = vmax.xlane.f32.xlu0 %v945_v8  ;;  %v1787_v10 = vpop.f32.mrb[12].mxu1  ;;  %v2399_v19 = vadd.f32 %v2341_v23, %v742_v4 }
  0xf4   :  { %v1848_v11 = vpop.f32.mrb[12].mxu0  ;;  %v377_v12 = vpop.f32.mrb[13].mxu1  ;;  %v2392_v13 = vadd.f32 %v2341_v23, %v737_v6 }
  0xf5   :  { %v752_v14 = vadd.f32 %v1848_v11, %v1787_v10  ;;  %v746_v15 = vpop.f32.mrb[13].mxu0  ;;  %v954_v29 = vsel %vm920_vm1, %v2399_v19, -inf }
  0xf6   :  { %v747_v16 = vadd.f32 %v746_v15, %v377_v12  ;;  %v951_v18 = vsel %vm920_vm1, %v2392_v13, -inf }
  0xf7   :  { %949 = vmax.xlane.f32.xlu1 %v948_v17  ;;  %952 = vmax.xlane.f32.xlu0 %v951_v18  ;;  %v1790_v20 = vpop.f32.mrb[14].mxu1  ;;  %v2409_v31 = vadd.f32 %v2341_v23, %v752_v14 }
  0xf8   :  { %v1851_v21 = vpop.f32.mrb[14].mxu0  ;;  %v387_v22 = vpop.f32.mrb[15].mxu1  ;;  %v2402_v24 = vadd.f32 %v2341_v23, %v747_v16 }
  0xf9   :  { %v762_v25 = vadd.f32 %v1851_v21, %v1790_v20  ;;  %v756_v26 = vpop.f32.mrb[15].mxu0  ;;  %v960_v41 = vsel %vm920_vm1, %v2409_v31, -inf }
  0xfa   :  { %v757_v27 = vadd.f32 %v756_v26, %v387_v22  ;;  %v957_v30 = vsel %vm920_vm1, %v2402_v24, -inf }
  0xfb   :  { %955 = vmax.xlane.f32.xlu1 %v954_v29  ;;  %958 = vmax.xlane.f32.xlu0 %v957_v30  ;;  %v1793_v32 = vpop.f32.mrb[16].mxu1  ;;  %v2419_v44 = vadd.f32 %v2341_v23, %v762_v25 }
  0xfc   :  { %v1854_v34 = vpop.f32.mrb[16].mxu0  ;;  %v397_v35 = vpop.f32.mrb[17].mxu1  ;;  %v2412_v36 = vadd.f32 %v2341_v23, %v757_v27 }
  0xfd   :  { %v772_v38 = vadd.f32 %v1854_v34, %v1793_v32  ;;  %v766_v39 = vpop.f32.mrb[17].mxu0  ;;  %v966_v54 = vsel %vm920_vm1, %v2419_v44, -inf }
  0xfe   :  { %v767_v40 = vadd.f32 %v766_v39, %v397_v35  ;;  %v963_v42 = vsel %vm920_vm1, %v2412_v36, -inf }
  0xff   :  { %961 = vmax.xlane.f32.xlu1 %v960_v41  ;;  %964 = vmax.xlane.f32.xlu0 %v963_v42  ;;  %v1796_v45 = vpop.f32.mrb[18].mxu1  ;;  %v2429_v56 = vadd.f32 %v2341_v23, %v772_v38 }
 0x100   :  { %v1857_v46 = vpop.f32.mrb[18].mxu0  ;;  %v407_v48 = vpop.f32.mrb[19].mxu1  ;;  %v2422_v49 = vadd.f32 %v2341_v23, %v767_v40 }
 0x101   :  { %v782_v50 = vadd.f32 %v1857_v46, %v1796_v45  ;;  %v776_v51 = vpop.f32.mrb[19].mxu0  ;;  %v972_v2 = vsel %vm920_vm1, %v2429_v56, -inf }
 0x102   :  { %v777_v52 = vadd.f32 %v776_v51, %v407_v48  ;;  %v969_v55 = vsel %vm920_vm1, %v2422_v49, -inf }
 0x103   :  { %967 = vmax.xlane.f32.xlu1 %v966_v54  ;;  %970 = vmax.xlane.f32.xlu0 %v969_v55  ;;  %v1799_v58 = vpop.f32.mrb[20].mxu1  ;;  %v2439_v5 = vadd.f32 %v2341_v23, %v782_v50 }
 0x104   :  { %v1860_v59 = vpop.f32.mrb[20].mxu0  ;;  %v417_v60 = vpop.f32.mrb[21].mxu1  ;;  %v2432_v61 = vadd.f32 %v2341_v23, %v777_v52 }
 0x105   :  { %v792_v62 = vadd.f32 %v1860_v59, %v1799_v58  ;;  %v786_v0 = vpop.f32.mrb[21].mxu0  ;;  %v978_v15 = vsel %vm920_vm1, %v2439_v5, -inf }
 0x106   :  { %v787_v1 = vadd.f32 %v786_v0, %v417_v60  ;;  %v975_v4 = vsel %vm920_vm1, %v2432_v61, -inf }
 0x107   :  { %973 = vmax.xlane.f32.xlu1 %v972_v2  ;;  %976 = vmax.xlane.f32.xlu0 %v975_v4  ;;  %v1802_v6 = vpop.f32.mrb[22].mxu1  ;;  %v2449_v17 = vadd.f32 %v2341_v23, %v792_v62 }
 0x108   :  { %v1863_v7 = vpop.f32.mrb[22].mxu0  ;;  %v427_v8 = vpop.f32.mrb[23].mxu1  ;;  %v2442_v10 = vadd.f32 %v2341_v23, %v787_v1 }
 0x109   :  { %v802_v11 = vadd.f32 %v1863_v7, %v1802_v6  ;;  %v796_v12 = vpop.f32.mrb[23].mxu0  ;;  %v984_v29 = vsel %vm920_vm1, %v2449_v17, -inf }
 0x10a   :  { %v797_v14 = vadd.f32 %v796_v12, %v427_v8  ;;  %v981_v16 = vsel %vm920_vm1, %v2442_v10, -inf }
 0x10b   :  { %979 = vmax.xlane.f32.xlu1 %v978_v15  ;;  %982 = vmax.xlane.f32.xlu0 %v981_v16  ;;  %v1805_v18 = vpop.f32.mrb[24].mxu1  ;;  %v2459_v32 = vadd.f32 %v2341_v23, %v802_v11 }
 0x10c   :  { %v1866_v20 = vpop.f32.mrb[24].mxu0  ;;  %v437_v21 = vpop.f32.mrb[25].mxu1  ;;  %v2452_v22 = vadd.f32 %v2341_v23, %v797_v14 }
 0x10d   :  { %v812_v25 = vadd.f32 %v1866_v20, %v1805_v18  ;;  %v806_v26 = vpop.f32.mrb[25].mxu0  ;;  %v990_v45 = vsel %vm920_vm1, %v2459_v32, -inf }
 0x10e   :  { %v807_v27 = vadd.f32 %v806_v26, %v437_v21  ;;  %v987_v30 = vsel %vm920_vm1, %v2452_v22, -inf }
 0x10f   :  { %985 = vmax.xlane.f32.xlu1 %v984_v29  ;;  %988 = vmax.xlane.f32.xlu0 %v987_v30  ;;  %v1808_v34 = vpop.f32.mrb[26].mxu1  ;;  %v2469_v48 = vadd.f32 %v2341_v23, %v812_v25 }
 0x110   :  { %v1869_v35 = vpop.f32.mrb[26].mxu0  ;;  %v447_v38 = vpop.f32.mrb[27].mxu1  ;;  %v2462_v39 = vadd.f32 %v2341_v23, %v807_v27 }
 0x111   :  { %v822_v40 = vadd.f32 %v1869_v35, %v1808_v34  ;;  %v816_v41 = vpop.f32.mrb[27].mxu0  ;;  %v996_v60 = vsel %vm920_vm1, %v2469_v48, -inf }
 0x112   :  { %v817_v42 = vadd.f32 %v816_v41, %v447_v38  ;;  %v993_v46 = vsel %vm920_vm1, %v2462_v39, -inf }
 0x113   :  { %991 = vmax.xlane.f32.xlu1 %v990_v45  ;;  %994 = vmax.xlane.f32.xlu0 %v993_v46  ;;  %v1811_v50 = vpop.f32.mrb[28].mxu1  ;;  %v2479_v0 = vadd.f32 %v2341_v23, %v822_v40 }
 0x114   :  { %v1872_v51 = vpop.f32.mrb[28].mxu0  ;;  %v457_v52 = vpop.f32.mrb[29].mxu1  ;;  %v2472_v54 = vadd.f32 %v2341_v23, %v817_v42 }
 0x115   :  { %v832_v55 = vadd.f32 %v1872_v51, %v1811_v50  ;;  %v826_v58 = vpop.f32.mrb[29].mxu0  ;;  %v1002_v12 = vsel %vm920_vm1, %v2479_v0, -inf }
 0x116   :  { %v827_v59 = vadd.f32 %v826_v58, %v457_v52  ;;  %v999_v62 = vsel %vm920_vm1, %v2472_v54, -inf }
 0x117   :  { %997 = vmax.xlane.f32.xlu1 %v996_v60  ;;  %1000 = vmax.xlane.f32.xlu0 %v999_v62  ;;  %v1814_v1 = vpop.f32.mrb[30].mxu1  ;;  %v2489_v15 = vadd.f32 %v2341_v23, %v832_v55 }
 0x118   :  { %v1875_v2 = vpop.f32.mrb[30].mxu0  ;;  %v467_v4 = vpop.f32.mrb[31].mxu1  ;;  %v2482_v6 = vadd.f32 %v2341_v23, %v827_v59 }
 0x119   :  { %v842_v7 = vadd.f32 %v1875_v2, %v1814_v1  ;;  %v836_v8 = vpop.f32.mrb[31].mxu0  ;;  %v1008_v29 = vsel %vm920_vm1, %v2489_v15, -inf }
 0x11a   :  { %v837_v11 = vadd.f32 %v836_v8, %v467_v4  ;;  %v1005_v14 = vsel %vm920_vm1, %v2482_v6, -inf }
 0x11b   :  { %1003 = vmax.xlane.f32.xlu1 %v1002_v12  ;;  %1006 = vmax.xlane.f32.xlu0 %v1005_v14  ;;  %v1817_v16 = vpop.f32.mrb[32].mxu1  ;;  %v2499_v34 = vadd.f32 %v2341_v23, %v842_v7 }
 0x11c   :  { %v1878_v18 = vpop.f32.mrb[32].mxu0  ;;  %v477_v20 = vpop.f32.mrb[33].mxu1  ;;  %v2492_v21 = vadd.f32 %v2341_v23, %v837_v11 }
 0x11d   :  { %v852_v25 = vadd.f32 %v1878_v18, %v1817_v16  ;;  %v846_v26 = vpop.f32.mrb[33].mxu0  ;;  %v1014_v50 = vsel %vm920_vm1, %v2499_v34, -inf }
 0x11e   :  { %v847_v27 = vadd.f32 %v846_v26, %v477_v20  ;;  %v1011_v30 = vsel %vm920_vm1, %v2492_v21, -inf }
 0x11f   :  { %1009 = vmax.xlane.f32.xlu1 %v1008_v29  ;;  %1012 = vmax.xlane.f32.xlu0 %v1011_v30  ;;  %v1820_v35 = vpop.f32.mrb[34].mxu1  ;;  %v2509_v52 = vadd.f32 %v2341_v23, %v852_v25 }
 0x120   :  { %v1881_v38 = vpop.f32.mrb[34].mxu0  ;;  %v487_v40 = vpop.f32.mrb[35].mxu1  ;;  %v2502_v41 = vadd.f32 %v2341_v23, %v847_v27 }
 0x121   :  { %v862_v42 = vadd.f32 %v1881_v38, %v1820_v35  ;;  %v856_v45 = vpop.f32.mrb[35].mxu0  ;;  %v1020_v4 = vsel %vm920_vm1, %v2509_v52, -inf }
 0x122   :  { %v857_v46 = vadd.f32 %v856_v45, %v487_v40  ;;  %v1017_v51 = vsel %vm920_vm1, %v2502_v41, -inf }
 0x123   :  { %1015 = vmax.xlane.f32.xlu1 %v1014_v50  ;;  %1018 = vmax.xlane.f32.xlu0 %v1017_v51  ;;  %v1823_v55 = vpop.f32.mrb[36].mxu1  ;;  %v2519_v8 = vadd.f32 %v2341_v23, %v862_v42 }
 0x124   :  { %v1884_v58 = vpop.f32.mrb[36].mxu0  ;;  %v497_v59 = vpop.f32.mrb[37].mxu1  ;;  %v2512_v60 = vadd.f32 %v2341_v23, %v857_v46 }
 0x125   :  { %v872_v62 = vadd.f32 %v1884_v58, %v1823_v55  ;;  %v866_v1 = vpop.f32.mrb[37].mxu0  ;;  %v1026_v12 = vsel %vm920_vm1, %v2519_v8, -inf }
 0x126   :  { %v867_v2 = vadd.f32 %v866_v1, %v497_v59  ;;  %v1023_v7 = vsel %vm920_vm1, %v2512_v60, -inf }
 0x127   :  { %1021 = vmax.xlane.f32.xlu1 %v1020_v4  ;;  %1024 = vmax.xlane.f32.xlu0 %v1023_v7  ;;  %v2529_v16 = vadd.f32 %v2341_v23, %v872_v62 }
 0x128   :  { %v2522_v11 = vadd.f32 %v2341_v23, %v867_v2 }
 0x129   :  { %v1032_v18 = vsel %vm920_vm1, %v2529_v16, -inf }
 0x12a   :  { %v1029_v14 = vsel %vm920_vm1, %v2522_v11, -inf }
 0x12b   :  { %1027 = vmax.xlane.f32.xlu1 %v1026_v12  ;;  %1030 = vmax.xlane.f32.xlu0 %v1029_v14 }
 0x12f   :  { %1033 = vmax.xlane.f32.xlu1 %v1032_v18 }
 0x170   :  { %v923_v20 = vpop.xlane.xlu0 %922 }
 0x171   :  { %v1035_v25 = vsub.f32 %v2344_v28, %v923_v20 }
 0x173   :  { %v1073_v26 = vmul.f32 1.442695, %v1035_v25 }
 0x174   :  { %v929_v27 = vpop.xlane.xlu1 %928  ;;  %v926_v29 = vpop.xlane.xlu0 %925 }
 0x175   :  { %1933 = vpow2.f32 %v1073_v26  ;;  %v1037_v30 = vsub.f32 %v2352_v37, %v929_v27  ;;  %v1036_v35 = vsub.f32 %v2349_v33, %v926_v29 }
 0x177   :  { %v1077_v38 = vmul.f32 1.442695, %v1037_v30  ;;  %v1075_v23 = vmul.f32 1.442695, %v1036_v35 }
 0x178   :  { %v932_v40 = vpop.xlane.xlu1 %931  ;;  %v935_v42 = vpop.xlane.xlu0 %934 }
 0x179   :  { %1935 = vpow2.f32 %v1077_v38  ;;  %v1038_v45 = vsub.f32 %v2359_v43, %v932_v40  ;;  %v1039_v46 = vsub.f32 %v2362_v47, %v935_v42 }
 0x17a   :  { %1937 = vpow2.f32 %v1075_v23 }
 0x17b   :  { %v1079_v50 = vmul.f32 1.442695, %v1038_v45  ;;  %v1081_v28 = vmul.f32 1.442695, %v1039_v46 }
 0x17c   :  { %v938_v51 = vpop.xlane.xlu1 %937  ;;  %v941_v55 = vpop.xlane.xlu0 %940 }
 0x17d   :  { %1939 = vpow2.f32 %v1079_v50  ;;  %v1040_v58 = vsub.f32 %v2369_v53, %v938_v51  ;;  %v1041_v37 = vsub.f32 %v2372_v57, %v941_v55 }
 0x17e   :  { %1941 = vpow2.f32 %v1081_v28 }
 0x17f   :  { %v2540_v33 = vpop.eup %1933  ;;  %v1083_v59 = vmul.f32 1.442695, %v1040_v58  ;;  %v1085_v62 = vmul.f32 1.442695, %v1041_v37 }
 0x180   :  { %v944_v1 = vpop.xlane.xlu1 %943  ;;  %v947_v2 = vpop.xlane.xlu0 %946  ;;  %v1149_v43 = vsel %vm920_vm1, %v2540_v33, 0.0 }
 0x181   :  { %1943 = vpow2.f32 %v1083_v59  ;;  %v1042_v47 = vsub.f32 %v2379_v63, %v944_v1  ;;  %v1043_v4 = vsub.f32 %v2382_v3, %v947_v2  ;;  %1150 = vadd.xlane.f32.xlu0 %v1149_v43 }
 0x182   :  { %1945 = vpow2.f32 %v1085_v62 }
 0x183   :  { %v2546_v53 = vpop.eup %1935  ;;  %v1087_v57 = vmul.f32 1.442695, %v1042_v47  ;;  %v1089_v7 = vmul.f32 1.442695, %v1043_v4 }
 0x184   :  { %v2548_v12 = vpop.eup %1937  ;;  %v950_v14 = vpop.xlane.xlu1 %949  ;;  %v1155_v20 = vsel %vm920_vm1, %v2546_v53, 0.0 }
 0x185   :  { %v953_v18 = vpop.xlane.xlu0 %952  ;;  %1947 = vpow2.f32 %v1087_v57  ;;  %v1044_v25 = vsub.f32 %v2389_v9, %v950_v14  ;;  %1156 = vadd.xlane.f32.xlu0 %v1155_v20  ;;  %v1152_v3 = vsel %vm920_vm1, %v2548_v12, 0.0 }
 0x186   :  { %v1045_v63 = vsub.f32 %v2392_v13, %v953_v18  ;;  %1949 = vpow2.f32 %v1089_v7  ;;  %1153 = vadd.xlane.f32.xlu1 %v1152_v3 }
 0x187   :  { %v2556_v26 = vpop.eup %1939  ;;  %v1091_v27 = vmul.f32 1.442695, %v1044_v25 }
 0x188   :  { %v1093_v29 = vmul.f32 1.442695, %v1045_v63  ;;  %v2558_v30 = vpop.eup %1941  ;;  %v956_v35 = vpop.xlane.xlu1 %955  ;;  %v1158_v23 = vsel %vm920_vm1, %v2556_v26, 0.0 }
 0x189   :  { %v959_v38 = vpop.xlane.xlu0 %958  ;;  %1951 = vpow2.f32 %v1091_v27  ;;  %v1046_v9 = vsub.f32 %v2399_v19, %v956_v35  ;;  %v1161_v40 = vsel %vm920_vm1, %v2558_v30, 0.0 }
 0x18a   :  { %v1047_v13 = vsub.f32 %v2402_v24, %v959_v38  ;;  %1953 = vpow2.f32 %v1093_v29  ;;  %1159 = vadd.xlane.f32.xlu1 %v1158_v23  ;;  %1162 = vadd.xlane.f32.xlu0 %v1161_v40 }
 0x18b   :  { %v2566_v42 = vpop.eup %1943  ;;  %v1095_v45 = vmul.f32 1.442695, %v1046_v9 }
 0x18c   :  { %v1097_v46 = vmul.f32 1.442695, %v1047_v13  ;;  %v2568_v50 = vpop.eup %1945  ;;  %v962_v28 = vpop.xlane.xlu1 %961  ;;  %v1164_v55 = vsel %vm920_vm1, %v2566_v42, 0.0 }
 0x18d   :  { %v965_v51 = vpop.xlane.xlu0 %964  ;;  %1955 = vpow2.f32 %v1095_v45  ;;  %v1048_v19 = vsub.f32 %v2409_v31, %v962_v28  ;;  %v1167_v58 = vsel %vm920_vm1, %v2568_v50, 0.0 }
 0x18e   :  { %v1049_v24 = vsub.f32 %v2412_v36, %v965_v51  ;;  %1957 = vpow2.f32 %v1097_v46  ;;  %1165 = vadd.xlane.f32.xlu1 %v1164_v55  ;;  %1168 = vadd.xlane.f32.xlu0 %v1167_v58 }
 0x18f   :  { %v2576_v37 = vpop.eup %1947  ;;  %v1099_v59 = vmul.f32 1.442695, %v1048_v19 }
 0x190   :  { %v1101_v62 = vmul.f32 1.442695, %v1049_v24  ;;  %v2578_v1 = vpop.eup %1949  ;;  %v968_v2 = vpop.xlane.xlu1 %967  ;;  %v1170_v47 = vsel %vm920_vm1, %v2576_v37, 0.0 }
 0x191   :  { %v971_v43 = vpop.xlane.xlu0 %970  ;;  %1959 = vpow2.f32 %v1099_v59  ;;  %v1050_v31 = vsub.f32 %v2419_v44, %v968_v2  ;;  %v1173_v4 = vsel %vm920_vm1, %v2578_v1, 0.0 }
 0x192   :  { %v1051_v36 = vsub.f32 %v2422_v49, %v971_v43  ;;  %1961 = vpow2.f32 %v1101_v62  ;;  %1171 = vadd.xlane.f32.xlu1 %v1170_v47  ;;  %1174 = vadd.xlane.f32.xlu0 %v1173_v4 }
 0x193   :  { %v2586_v57 = vpop.eup %1951  ;;  %v1103_v7 = vmul.f32 1.442695, %v1050_v31 }
 0x194   :  { %v1105_v14 = vmul.f32 1.442695, %v1051_v36  ;;  %v2588_v18 = vpop.eup %1953  ;;  %v974_v20 = vpop.xlane.xlu1 %973  ;;  %v1176_v63 = vsel %vm920_vm1, %v2586_v57, 0.0 }
 0x195   :  { %v977_v25 = vpop.xlane.xlu0 %976  ;;  %1963 = vpow2.f32 %v1103_v7  ;;  %v1052_v44 = vsub.f32 %v2429_v56, %v974_v20  ;;  %v1179_v3 = vsel %vm920_vm1, %v2588_v18, 0.0 }
 0x196   :  { %v1053_v49 = vsub.f32 %v2432_v61, %v977_v25  ;;  %1965 = vpow2.f32 %v1105_v14  ;;  %1177 = vadd.xlane.f32.xlu1 %v1176_v63  ;;  %1180 = vadd.xlane.f32.xlu0 %v1179_v3 }
 0x197   :  { %v2596_v27 = vpop.eup %1955  ;;  %v1107_v29 = vmul.f32 1.442695, %v1052_v44 }
 0x198   :  { %v1109_v35 = vmul.f32 1.442695, %v1053_v49  ;;  %v2598_v38 = vpop.eup %1957  ;;  %v980_v23 = vpop.xlane.xlu1 %979  ;;  %v1182_v13 = vsel %vm920_vm1, %v2596_v27, 0.0 }
 0x199   :  { %v983_v9 = vpop.xlane.xlu0 %982  ;;  %1967 = vpow2.f32 %v1107_v29  ;;  %v1054_v56 = vsub.f32 %v2439_v5, %v980_v23  ;;  %v1185_v40 = vsel %vm920_vm1, %v2598_v38, 0.0 }
 0x19a   :  { %v1055_v61 = vsub.f32 %v2442_v10, %v983_v9  ;;  %1969 = vpow2.f32 %v1109_v35  ;;  %1183 = vadd.xlane.f32.xlu1 %v1182_v13  ;;  %1186 = vadd.xlane.f32.xlu0 %v1185_v40 }
 0x19b   :  { %v2606_v45 = vpop.eup %1959  ;;  %v1111_v46 = vmul.f32 1.442695, %v1054_v56 }
 0x19c   :  { %v1113_v28 = vmul.f32 1.442695, %v1055_v61  ;;  %v2608_v51 = vpop.eup %1961  ;;  %v986_v55 = vpop.xlane.xlu1 %985  ;;  %v1188_v24 = vsel %vm920_vm1, %v2606_v45, 0.0 }
 0x19d   :  { %v989_v19 = vpop.xlane.xlu0 %988  ;;  %1971 = vpow2.f32 %v1111_v46  ;;  %v1056_v5 = vsub.f32 %v2449_v17, %v986_v55  ;;  %v1191_v58 = vsel %vm920_vm1, %v2608_v51, 0.0 }
 0x19e   :  { %v1057_v10 = vsub.f32 %v2452_v22, %v989_v19  ;;  %1973 = vpow2.f32 %v1113_v28  ;;  %1189 = vadd.xlane.f32.xlu1 %v1188_v24  ;;  %1192 = vadd.xlane.f32.xlu0 %v1191_v58 }
 0x19f   :  { %v2616_v59 = vpop.eup %1963  ;;  %v1115_v62 = vmul.f32 1.442695, %v1056_v5 }
 0x1a0   :  { %v1117_v2 = vmul.f32 1.442695, %v1057_v10  ;;  %v2618_v43 = vpop.eup %1965  ;;  %v992_v47 = vpop.xlane.xlu1 %991  ;;  %v1194_v36 = vsel %vm920_vm1, %v2616_v59, 0.0 }
 0x1a1   :  { %v995_v31 = vpop.xlane.xlu0 %994  ;;  %1975 = vpow2.f32 %v1115_v62  ;;  %v1058_v17 = vsub.f32 %v2459_v32, %v992_v47  ;;  %v1197_v4 = vsel %vm920_vm1, %v2618_v43, 0.0 }
 0x1a2   :  { %v1059_v22 = vsub.f32 %v2462_v39, %v995_v31  ;;  %1977 = vpow2.f32 %v1117_v2  ;;  %1195 = vadd.xlane.f32.xlu1 %v1194_v36  ;;  %1198 = vadd.xlane.f32.xlu0 %v1197_v4 }
 0x1a3   :  { %v2626_v7 = vpop.eup %1967  ;;  %v1119_v14 = vmul.f32 1.442695, %v1058_v17 }
 0x1a4   :  { %v1121_v20 = vmul.f32 1.442695, %v1059_v22  ;;  %v2628_v25 = vpop.eup %1969  ;;  %v998_v63 = vpop.xlane.xlu1 %997  ;;  %v1200_v49 = vsel %vm920_vm1, %v2626_v7, 0.0 }
 0x1a5   :  { %v1001_v44 = vpop.xlane.xlu0 %1000  ;;  %1979 = vpow2.f32 %v1119_v14  ;;  %v1060_v32 = vsub.f32 %v2469_v48, %v998_v63  ;;  %v1203_v3 = vsel %vm920_vm1, %v2628_v25, 0.0 }
 0x1a6   :  { %v1061_v39 = vsub.f32 %v2472_v54, %v1001_v44  ;;  %1981 = vpow2.f32 %v1121_v20  ;;  %1201 = vadd.xlane.f32.xlu1 %v1200_v49  ;;  %1204 = vadd.xlane.f32.xlu0 %v1203_v3 }
 0x1a7   :  { %v2636_v29 = vpop.eup %1971  ;;  %v1123_v35 = vmul.f32 1.442695, %v1060_v32 }
 0x1a8   :  { %v1125_v23 = vmul.f32 1.442695, %v1061_v39  ;;  %v2638_v9 = vpop.eup %1973  ;;  %v1004_v13 = vpop.xlane.xlu1 %1003  ;;  %v1206_v61 = vsel %vm920_vm1, %v2636_v29, 0.0 }
 0x1a9   :  { %v1007_v56 = vpop.xlane.xlu0 %1006  ;;  %1983 = vpow2.f32 %v1123_v35  ;;  %v1062_v48 = vsub.f32 %v2479_v0, %v1004_v13  ;;  %v1209_v40 = vsel %vm920_vm1, %v2638_v9, 0.0 }
 0x1aa   :  { %v1063_v54 = vsub.f32 %v2482_v6, %v1007_v56  ;;  %1985 = vpow2.f32 %v1125_v23  ;;  %1207 = vadd.xlane.f32.xlu1 %v1206_v61  ;;  %1210 = vadd.xlane.f32.xlu0 %v1209_v40 }
 0x1ab   :  { %v2646_v46 = vpop.eup %1975  ;;  %v1127_v28 = vmul.f32 1.442695, %v1062_v48 }
 0x1ac   :  { %v1129_v55 = vmul.f32 1.442695, %v1063_v54  ;;  %v2648_v19 = vpop.eup %1977  ;;  %v1010_v24 = vpop.xlane.xlu1 %1009  ;;  %v1212_v10 = vsel %vm920_vm1, %v2646_v46, 0.0 }
 0x1ad   :  { %v1013_v5 = vpop.xlane.xlu0 %1012  ;;  %1987 = vpow2.f32 %v1127_v28  ;;  %v1064_v0 = vsub.f32 %v2489_v15, %v1010_v24  ;;  %v1215_v58 = vsel %vm920_vm1, %v2648_v19, 0.0 }
 0x1ae   :  { %v1065_v6 = vsub.f32 %v2492_v21, %v1013_v5  ;;  %1989 = vpow2.f32 %v1129_v55  ;;  %1213 = vadd.xlane.f32.xlu1 %v1212_v10  ;;  %1216 = vadd.xlane.f32.xlu0 %v1215_v58 }
 0x1af   :  { %v2656_v62 = vpop.eup %1979  ;;  %v1131_v2 = vmul.f32 1.442695, %v1064_v0 }
 0x1b0   :  { %v1133_v47 = vmul.f32 1.442695, %v1065_v6  ;;  %v2658_v31 = vpop.eup %1981  ;;  %v1016_v36 = vpop.xlane.xlu1 %1015  ;;  %v1218_v22 = vsel %vm920_vm1, %v2656_v62, 0.0 }
 0x1b1   :  { %v1019_v17 = vpop.xlane.xlu0 %1018  ;;  %1991 = vpow2.f32 %v1131_v2  ;;  %v1066_v15 = vsub.f32 %v2499_v34, %v1016_v36  ;;  %v1221_v4 = vsel %vm920_vm1, %v2658_v31, 0.0 }
 0x1b2   :  { %v1067_v21 = vsub.f32 %v2502_v41, %v1019_v17  ;;  %1993 = vpow2.f32 %v1133_v47  ;;  %1219 = vadd.xlane.f32.xlu1 %v1218_v22  ;;  %1222 = vadd.xlane.f32.xlu0 %v1221_v4 }
 0x1b3   :  { %v2666_v14 = vpop.eup %1983  ;;  %v1135_v20 = vmul.f32 1.442695, %v1066_v15 }
 0x1b4   :  { %v1137_v63 = vmul.f32 1.442695, %v1067_v21  ;;  %v2668_v44 = vpop.eup %1985  ;;  %v1022_v49 = vpop.xlane.xlu1 %1021  ;;  %v1224_v39 = vsel %vm920_vm1, %v2666_v14, 0.0 }
 0x1b5   :  { %v1025_v32 = vpop.xlane.xlu0 %1024  ;;  %1995 = vpow2.f32 %v1135_v20  ;;  %v1068_v34 = vsub.f32 %v2509_v52, %v1022_v49  ;;  %v1227_v3 = vsel %vm920_vm1, %v2668_v44, 0.0 }
 0x1b6   :  { %v1069_v41 = vsub.f32 %v2512_v60, %v1025_v32  ;;  %1997 = vpow2.f32 %v1137_v63  ;;  %1225 = vadd.xlane.f32.xlu1 %v1224_v39  ;;  %1228 = vadd.xlane.f32.xlu0 %v1227_v3  ;;  %v2109_v39 = vmov 0.0  }
 0x1b7   :  { %v2676_v35 = vpop.eup %1987  ;;  %v1139_v23 = vmul.f32 1.442695, %v1068_v34  ;;  %55 = vst.msk [vmem:[#allocation2] sm:$0x1] %vm54_vm2, %v2109_v39 }
 0x1b8   :  { %v1141_v13 = vmul.f32 1.442695, %v1069_v41  ;;  %v2678_v56 = vpop.eup %1989  ;;  %v1028_v61 = vpop.xlane.xlu1 %1027  ;;  %v1230_v54 = vsel %vm920_vm1, %v2676_v35, 0.0 }
 0x1b9   :  { %v1031_v48 = vpop.xlane.xlu0 %1030  ;;  %1999 = vpow2.f32 %v1139_v23  ;;  %v1070_v52 = vsub.f32 %v2519_v8, %v1028_v61  ;;  %v1233_v40 = vsel %vm920_vm1, %v2678_v56, 0.0 }
 0x1ba   :  { %v1071_v60 = vsub.f32 %v2522_v11, %v1031_v48  ;;  %2001 = vpow2.f32 %v1141_v13  ;;  %1231 = vadd.xlane.f32.xlu1 %v1230_v54  ;;  %1234 = vadd.xlane.f32.xlu0 %v1233_v40 }
 0x1bb   :  { %v2686_v28 = vpop.eup %1991  ;;  %v1143_v55 = vmul.f32 1.442695, %v1070_v52 }
 0x1bc   :  { %v1145_v24 = vmul.f32 1.442695, %v1071_v60  ;;  %v2688_v5 = vpop.eup %1993  ;;  %v1034_v10 = vpop.xlane.xlu1 %1033  ;;  %v1236_v0 = vsel %vm920_vm1, %v2686_v28, 0.0 }
 0x1bd   :  { %2003 = vpow2.f32 %v1143_v55  ;;  %v1072_v8 = vsub.f32 %v2529_v16, %v1034_v10  ;;  %v1239_v11 = vsel %vm920_vm1, %v2688_v5, 0.0 }
 0x1be   :  { %2005 = vpow2.f32 %v1145_v24  ;;  %1237 = vadd.xlane.f32.xlu1 %v1236_v0  ;;  %1240 = vadd.xlane.f32.xlu0 %v1239_v11 }
 0x1bf   :  { %v2695_v6 = vpop.eup %1995  ;;  %v1147_v58 = vmul.f32 1.442695, %v1072_v8 }
 0x1c0   :  { %v2697_v2 = vpop.eup %1997  ;;  %v1242_v47 = vsel %vm920_vm1, %v2695_v6, 0.0 }
 0x1c1   :  { %2007 = vpow2.f32 %v1147_v58  ;;  %v1245_v36 = vsel %vm920_vm1, %v2697_v2, 0.0 }
 0x1c2   :  { %1243 = vadd.xlane.f32.xlu1 %v1242_v47  ;;  %1246 = vadd.xlane.f32.xlu0 %v1245_v36 }
 0x1c3   :  { %v2703_v16 = vpop.eup %1999 }
 0x1c4   :  { %v2705_v17 = vpop.eup %2001  ;;  %v1248_v22 = vsel %vm920_vm1, %v2703_v16, 0.0 }
 0x1c5   :  { %v1251_v15 = vsel %vm920_vm1, %v2705_v17, 0.0 }
 0x1c6   :  { %1249 = vadd.xlane.f32.xlu1 %v1248_v22  ;;  %1252 = vadd.xlane.f32.xlu0 %v1251_v15 }
 0x1c7   :  { %v2711_v21 = vpop.eup %2003 }
 0x1c8   :  { %v2713_v4 = vpop.eup %2005  ;;  %v1254_v20 = vsel %vm920_vm1, %v2711_v21, 0.0 }
 0x1c9   :  { %v1257_v63 = vsel %vm920_vm1, %v2713_v4, 0.0 }
 0x1ca   :  { %1255 = vadd.xlane.f32.xlu1 %v1254_v20  ;;  %1258 = vadd.xlane.f32.xlu0 %v1257_v63 }
 0x1cb   :  { %v2719_v49 = vpop.eup %2007 }
 0x1cc   :  { %v1260_v32 = vsel %vm920_vm1, %v2719_v49, 0.0 }
 0x1ce   :  { %1261 = vadd.xlane.f32.xlu1 %v1260_v32 }
 0x20e   :  { %v1151_v34 = vpop.xlane.xlu0 %1150 }
 0x20f   :  { %2009 = vrcp.f32 %v1151_v34 }
 0x212   :  { %v1157_v41 = vpop.xlane.xlu0 %1156 }
 0x213   :  { %v1154_v3 = vpop.xlane.xlu1 %1153  ;;  %2011 = vrcp.f32 %v1157_v41 }
 0x214   :  { %2013 = vrcp.f32 %v1154_v3 }
 0x217   :  { %v1160_v23 = vpop.xlane.xlu1 %1159  ;;  %v1163_v13 = vpop.xlane.xlu0 %1162 }
 0x218   :  { %2015 = vrcp.f32 %v1160_v23 }
 0x219   :  { %2017 = vrcp.f32 %v1163_v13  ;;  %v2010_v61 = vpop.eup %2009 }
 0x21a   :  { %v1301_v60 = vmul.f32 %v2010_v61, %v2540_v33 }
 0x21b   :  { %v1166_v48 = vpop.xlane.xlu1 %1165  ;;  %v1169_v54 = vpop.xlane.xlu0 %1168 }
 0x21c   :  { %2019 = vrcp.f32 %v1166_v48  ;;  %v1496_v8 = vsel %vm920_vm1, %v1301_v60, 0.0 }
 0x21d   :  { %v2012_v52 = vpop.eup %2011  ;;  %2021 = vrcp.f32 %v1169_v54 }
 0x21e   :  { %v2014_v40 = vpop.eup %2013  ;;  %v1303_v24 = vmul.f32 %v2012_v52, %v2546_v53 }
 0x21f   :  { %v1302_v55 = vmul.f32 %v2014_v40, %v2548_v12  ;;  %v1172_v10 = vpop.xlane.xlu1 %1171  ;;  %v1175_v0 = vpop.xlane.xlu0 %1174 }
 0x220   :  { %2023 = vrcp.f32 %v1172_v10  ;;  %v1499_v22 = vsel %vm920_vm1, %v1303_v24, 0.0 }
 0x221   :  { %v1497_v11 = vsel %vm920_vm1, %v1302_v55, 0.0  ;;  %2025 = vrcp.f32 %v1175_v0 }
 0x222   :  { %v2016_v58 = vpop.eup %2015  ;;  %v1498_v47 = vadd.f32 %v1497_v11, %v1496_v8 }
 0x223   :  { %v2018_v36 = vpop.eup %2017  ;;  %v1304_v33 = vmul.f32 %v2016_v58, %v2556_v26  ;;  %v1178_v15 = vpop.xlane.xlu1 %1177 }
 0x224   :  { %v1181_v20 = vpop.xlane.xlu0 %1180  ;;  %v1500_v12 = vadd.f32 %v1499_v22, %v1498_v47  ;;  %v1305_v53 = vmul.f32 %v2018_v36, %v2558_v30  ;;  %2027 = vrcp.f32 %v1178_v15 }
 0x225   :  { %v1501_v63 = vsel %vm920_vm1, %v1304_v33, 0.0  ;;  %2029 = vrcp.f32 %v1181_v20 }
 0x226   :  { %v2020_v32 = vpop.eup %2019  ;;  %v1502_v39 = vadd.f32 %v1501_v63, %v1500_v12  ;;  %v1503_v41 = vsel %vm920_vm1, %v1305_v53, 0.0 }
 0x227   :  { %v2022_v34 = vpop.eup %2021  ;;  %v1306_v3 = vmul.f32 %v2020_v32, %v2566_v42  ;;  %v1184_v23 = vpop.xlane.xlu1 %1183 }
 0x228   :  { %v1187_v13 = vpop.xlane.xlu0 %1186  ;;  %v1504_v61 = vadd.f32 %v1503_v41, %v1502_v39  ;;  %v1307_v26 = vmul.f32 %v2022_v34, %v2568_v50  ;;  %2031 = vrcp.f32 %v1184_v23 }
 0x229   :  { %v1505_v48 = vsel %vm920_vm1, %v1306_v3, 0.0  ;;  %2033 = vrcp.f32 %v1187_v13 }
 0x22a   :  { %v2024_v30 = vpop.eup %2023  ;;  %v1506_v54 = vadd.f32 %v1505_v48, %v1504_v61  ;;  %v1507_v60 = vsel %vm920_vm1, %v1307_v26, 0.0 }
 0x22b   :  { %v2026_v52 = vpop.eup %2025  ;;  %v1308_v40 = vmul.f32 %v2024_v30, %v2576_v37  ;;  %v1190_v55 = vpop.xlane.xlu1 %1189 }
 0x22c   :  { %v1193_v24 = vpop.xlane.xlu0 %1192  ;;  %v1508_v10 = vadd.f32 %v1507_v60, %v1506_v54  ;;  %v1309_v42 = vmul.f32 %v2026_v52, %v2578_v1  ;;  %2035 = vrcp.f32 %v1190_v55 }
 0x22d   :  { %v1509_v0 = vsel %vm920_vm1, %v1308_v40, 0.0  ;;  %2037 = vrcp.f32 %v1193_v24 }
 0x22e   :  { %v2028_v50 = vpop.eup %2027  ;;  %v1510_v8 = vadd.f32 %v1509_v0, %v1508_v10  ;;  %v1511_v58 = vsel %vm920_vm1, %v1309_v42, 0.0 }
 0x22f   :  { %v2030_v11 = vpop.eup %2029  ;;  %v1310_v47 = vmul.f32 %v2028_v50, %v2586_v57  ;;  %v1196_v36 = vpop.xlane.xlu1 %1195 }
 0x230   :  { %v1199_v22 = vpop.xlane.xlu0 %1198  ;;  %v1512_v33 = vadd.f32 %v1511_v58, %v1510_v8  ;;  %v1311_v37 = vmul.f32 %v2030_v11, %v2588_v18  ;;  %2039 = vrcp.f32 %v1196_v36 }
 0x231   :  { %v1513_v15 = vsel %vm920_vm1, %v1310_v47, 0.0  ;;  %2041 = vrcp.f32 %v1199_v22 }
 0x232   :  { %v2032_v1 = vpop.eup %2031  ;;  %v1514_v20 = vadd.f32 %v1513_v15, %v1512_v33  ;;  %v1515_v53 = vsel %vm920_vm1, %v1311_v37, 0.0 }
 0x233   :  { %v2034_v12 = vpop.eup %2033  ;;  %v1312_v63 = vmul.f32 %v2032_v1, %v2596_v27  ;;  %v1202_v32 = vpop.xlane.xlu1 %1201 }
 0x234   :  { %v1205_v39 = vpop.xlane.xlu0 %1204  ;;  %v1516_v34 = vadd.f32 %v1515_v53, %v1514_v20  ;;  %v1313_v57 = vmul.f32 %v2034_v12, %v2598_v38  ;;  %2043 = vrcp.f32 %v1202_v32 }
 0x235   :  { %v1517_v41 = vsel %vm920_vm1, %v1312_v63, 0.0  ;;  %2045 = vrcp.f32 %v1205_v39 }
 0x236   :  { %v2036_v18 = vpop.eup %2035  ;;  %v1518_v3 = vadd.f32 %v1517_v41, %v1516_v34  ;;  %v1519_v13 = vsel %vm920_vm1, %v1313_v57, 0.0 }
 0x237   :  { %v2038_v23 = vpop.eup %2037  ;;  %v1314_v61 = vmul.f32 %v2036_v18, %v2606_v45  ;;  %v1208_v26 = vpop.xlane.xlu1 %1207 }
 0x238   :  { %v1211_v48 = vpop.xlane.xlu0 %1210  ;;  %v1520_v30 = vadd.f32 %v1519_v13, %v1518_v3  ;;  %v1315_v27 = vmul.f32 %v2038_v23, %v2608_v51  ;;  %2047 = vrcp.f32 %v1208_v26 }
 0x239   :  { %v1521_v54 = vsel %vm920_vm1, %v1314_v61, 0.0  ;;  %2049 = vrcp.f32 %v1211_v48 }
 0x23a   :  { %v2040_v38 = vpop.eup %2039  ;;  %v1522_v52 = vadd.f32 %v1521_v54, %v1520_v30  ;;  %v1523_v40 = vsel %vm920_vm1, %v1315_v27, 0.0 }
 0x23b   :  { %v2042_v60 = vpop.eup %2041  ;;  %v1316_v55 = vmul.f32 %v2040_v38, %v2616_v59  ;;  %v1214_v24 = vpop.xlane.xlu1 %1213 }
 0x23c   :  { %v1217_v10 = vpop.xlane.xlu0 %1216  ;;  %v1524_v42 = vadd.f32 %v1523_v40, %v1522_v52  ;;  %v1317_v45 = vmul.f32 %v2042_v60, %v2618_v43  ;;  %2051 = vrcp.f32 %v1214_v24 }
 0x23d   :  { %v1525_v0 = vsel %vm920_vm1, %v1316_v55, 0.0  ;;  %2053 = vrcp.f32 %v1217_v10 }
 0x23e   :  { %v2044_v51 = vpop.eup %2043  ;;  %v1526_v50 = vadd.f32 %v1525_v0, %v1524_v42  ;;  %v1527_v11 = vsel %vm920_vm1, %v1317_v45, 0.0 }
 0x23f   :  { %v2046_v8 = vpop.eup %2045  ;;  %v1318_v58 = vmul.f32 %v2044_v51, %v2626_v7  ;;  %v1220_v47 = vpop.xlane.xlu1 %1219 }
 0x240   :  { %v1223_v36 = vpop.xlane.xlu0 %1222  ;;  %v1528_v22 = vadd.f32 %v1527_v11, %v1526_v50  ;;  %v1319_v59 = vmul.f32 %v2046_v8, %v2628_v25  ;;  %2055 = vrcp.f32 %v1220_v47 }
 0x241   :  { %v1529_v33 = vsel %vm920_vm1, %v1318_v58, 0.0  ;;  %2057 = vrcp.f32 %v1223_v36 }
 0x242   :  { %v2048_v43 = vpop.eup %2047  ;;  %v1530_v37 = vadd.f32 %v1529_v33, %v1528_v22  ;;  %v1531_v1 = vsel %vm920_vm1, %v1319_v59, 0.0 }
 0x243   :  { %v2050_v15 = vpop.eup %2049  ;;  %v1320_v20 = vmul.f32 %v2048_v43, %v2636_v29  ;;  %v1226_v12 = vpop.xlane.xlu1 %1225 }
 0x244   :  { %v1229_v53 = vpop.xlane.xlu0 %1228  ;;  %v1532_v63 = vadd.f32 %v1531_v1, %v1530_v37  ;;  %v1321_v7 = vmul.f32 %v2050_v15, %v2638_v9  ;;  %2059 = vrcp.f32 %v1226_v12 }
 0x245   :  { %v1533_v32 = vsel %vm920_vm1, %v1320_v20, 0.0  ;;  %2061 = vrcp.f32 %v1229_v53 }
 0x246   :  { %v2052_v25 = vpop.eup %2051  ;;  %v1534_v39 = vadd.f32 %v1533_v32, %v1532_v63  ;;  %v1535_v57 = vsel %vm920_vm1, %v1321_v7, 0.0  ;;  %v1341_v63 = vlaneseq }
 0x247   :  { %v2054_v34 = vpop.eup %2053  ;;  %v1322_v41 = vmul.f32 %v2052_v25, %v2646_v46  ;;  %v1232_v18 = vpop.xlane.xlu1 %1231 }
 0x248   :  { %v1235_v3 = vpop.xlane.xlu0 %1234  ;;  %v1536_v23 = vadd.f32 %v1535_v57, %v1534_v39  ;;  %v1323_v29 = vmul.f32 %v2054_v34, %v2648_v19  ;;  %2063 = vrcp.f32 %v1232_v18  ;;  %v1342_v18 = vshrl.u32 %v1341_v63, 7 }
 0x249   :  { %v1537_v13 = vsel %vm920_vm1, %v1322_v41, 0.0  ;;  %2065 = vrcp.f32 %v1235_v3 }
 0x24a   :  { %v2056_v9 = vpop.eup %2055  ;;  %v1538_v61 = vadd.f32 %v1537_v13, %v1536_v23  ;;  %v1539_v48 = vsel %vm920_vm1, %v1323_v29, 0.0 }
 0x24b   :  { %v2058_v26 = vpop.eup %2057  ;;  %v1324_v30 = vmul.f32 %v2056_v9, %v2656_v62  ;;  %v1238_v27 = vpop.xlane.xlu1 %1237 }
 0x24c   :  { %v1241_v54 = vpop.xlane.xlu0 %1240  ;;  %v1540_v38 = vadd.f32 %v1539_v48, %v1538_v61  ;;  %v1325_v46 = vmul.f32 %v2058_v26, %v2658_v31  ;;  %2067 = vrcp.f32 %v1238_v27  ;;  %v1379_v48 = vadd.s32 296, %v1342_v18 }
 0x24d   :  { %v1541_v52 = vsel %vm920_vm1, %v1324_v30, 0.0  ;;  %2069 = vrcp.f32 %v1241_v54 }
 0x24e   :  { %v2060_v19 = vpop.eup %2059  ;;  %v1542_v60 = vadd.f32 %v1541_v52, %v1540_v38  ;;  %v1543_v55 = vsel %vm920_vm1, %v1325_v46, 0.0  ;;  %vm1456_vm3 = vcmp.lt.s32.totalorder %v1379_v48, 300 }
 0x24f   :  { %v2062_v40 = vpop.eup %2061  ;;  %v1326_v24 = vmul.f32 %v2060_v19, %v2666_v14  ;;  %v1244_v10 = vpop.xlane.xlu1 %1243 }
 0x250   :  { %v1247_v42 = vpop.xlane.xlu0 %1246  ;;  %v1544_v45 = vadd.f32 %v1543_v55, %v1542_v60  ;;  %v1327_v62 = vmul.f32 %v2062_v40, %v2668_v44  ;;  %2071 = vrcp.f32 %v1244_v10 }
 0x251   :  { %v1545_v0 = vsel %vm920_vm1, %v1326_v24, 0.0  ;;  %2073 = vrcp.f32 %v1247_v42 }
 0x252   :  { %v2064_v31 = vpop.eup %2063  ;;  %v1546_v51 = vadd.f32 %v1545_v0, %v1544_v45  ;;  %v1547_v8 = vsel %vm920_vm1, %v1327_v62, 0.0 }
 0x253   :  { %v2066_v50 = vpop.eup %2065  ;;  %v1328_v11 = vmul.f32 %v2064_v31, %v2676_v35  ;;  %v1250_v58 = vpop.xlane.xlu1 %1249 }
 0x254   :  { %v1253_v47 = vpop.xlane.xlu0 %1252  ;;  %v1548_v36 = vadd.f32 %v1547_v8, %v1546_v51  ;;  %v1329_v14 = vmul.f32 %v2066_v50, %v2678_v56  ;;  %2075 = vrcp.f32 %v1250_v58 }
 0x255   :  { %v1549_v22 = vsel %vm920_vm1, %v1328_v11, 0.0  ;;  %2077 = vrcp.f32 %v1253_v47 }
 0x256   :  { %v2068_v44 = vpop.eup %2067  ;;  %v1550_v59 = vadd.f32 %v1549_v22, %v1548_v36  ;;  %v1551_v43 = vsel %vm920_vm1, %v1329_v14, 0.0 }
 0x257   :  { %v2070_v33 = vpop.eup %2069  ;;  %v1330_v37 = vmul.f32 %v2068_v44, %v2686_v28  ;;  %v1256_v15 = vpop.xlane.xlu1 %1255 }
 0x258   :  { %v1259_v1 = vpop.xlane.xlu0 %1258  ;;  %v1552_v20 = vadd.f32 %v1551_v43, %v1550_v59  ;;  %v1331_v35 = vmul.f32 %v2070_v33, %v2688_v5  ;;  %2079 = vrcp.f32 %v1256_v15 }
 0x259   :  { %v1553_v12 = vsel %vm920_vm1, %v1330_v37, 0.0  ;;  %2081 = vrcp.f32 %v1259_v1 }
 0x25a   :  { %v2072_v56 = vpop.eup %2071  ;;  %v1554_v53 = vadd.f32 %v1553_v12, %v1552_v20  ;;  %v1555_v32 = vsel %vm920_vm1, %v1331_v35, 0.0 }
 0x25b   :  { %v2074_v7 = vpop.eup %2073  ;;  %v1332_v25 = vmul.f32 %v2072_v56, %v2695_v6  ;;  %v1262_v39 = vpop.xlane.xlu1 %1261 }
 0x25c   :  { %v1556_v34 = vadd.f32 %v1555_v32, %v1554_v53  ;;  %v1333_v28 = vmul.f32 %v2074_v7, %v2697_v2  ;;  %2083 = vrcp.f32 %v1262_v39 }
 0x25d   :  { %v1557_v57 = vsel %vm920_vm1, %v1332_v25, 0.0 }
 0x25e   :  { %v2076_v5 = vpop.eup %2075  ;;  %v1558_v41 = vadd.f32 %v1557_v57, %v1556_v34  ;;  %v1559_v23 = vsel %vm920_vm1, %v1333_v28, 0.0 }
 0x25f   :  { %v2078_v3 = vpop.eup %2077  ;;  %v1334_v29 = vmul.f32 %v2076_v5, %v2703_v16 }
 0x260   :  { %v1560_v13 = vadd.f32 %v1559_v23, %v1558_v41  ;;  %v1335_v9 = vmul.f32 %v2078_v3, %v2705_v17 }
 0x261   :  { %v1561_v6 = vsel %vm920_vm1, %v1334_v29, 0.0 }
 0x262   :  { %v2080_v61 = vpop.eup %2079  ;;  %v1562_v26 = vadd.f32 %v1561_v6, %v1560_v13  ;;  %v1563_v30 = vsel %vm920_vm1, %v1335_v9, 0.0 }
 0x263   :  { %v2082_v2 = vpop.eup %2081  ;;  %v1336_v27 = vmul.f32 %v2080_v61, %v2711_v21 }
 0x264   :  { %v1564_v54 = vadd.f32 %v1563_v30, %v1562_v26  ;;  %v1337_v38 = vmul.f32 %v2082_v2, %v2713_v4  ;;  %v1495_v4 = vld [vmem:[#allocation2] sm:$0x1] }
 0x265   :  { %v1565_v46 = vsel %vm920_vm1, %v1336_v27, 0.0 }
 0x266   :  { %v2084_v52 = vpop.eup %2083  ;;  %v1566_v16 = vadd.f32 %v1565_v46, %v1564_v54  ;;  %v1567_v17 = vsel %vm920_vm1, %v1337_v38, 0.0 }
 0x267   :  { %v1338_v19 = vmul.f32 %v2084_v52, %v2719_v49 }
 0x268   :  { %v1568_v60 = vadd.f32 %v1567_v17, %v1566_v16 }
 0x269   :  { %v1494_v40 = vsel %vm1456_vm3, %v1338_v19, 0.0 }
 0x26a   :  { %v1569_v55 = vsel %vm920_vm1, %v1494_v40, 0.0 }
 0x26b   :  { %v1570_v24 = vadd.f32 %v1569_v55, %v1568_v60 }
 0x26d   :  { %v1571_v10 = vrot.slane %v1570_v24, 4 }
 0x26f   :  { %v1572_v42 = vadd.f32 %v1571_v10, %v1570_v24 }
 0x271   :  { %v1573_v21 = vrot.slane %v1572_v42, 2 }
 0x273   :  { %v1574_v45 = vadd.f32 %v1573_v21, %v1572_v42 }
 0x275   :  { %v1575_v62 = vrot.slane %v1574_v45, 1 }
 0x277   :  { %v1576_v0 = vadd.f32 %v1575_v62, %v1574_v45 }
 0x279   :  { %v1577_v31 = vadd.f32 %v1576_v0, %v1495_v4 }
 0x27b   :  { %1579 = vst.msk [vmem:[#allocation2] sm:$0x1] %vm54_vm2, %v1577_v31 }
 0x282   :  { %v1583_v51 = vld [vmem:[#allocation2] sm:$0x1] }
 0x283   :  { %v1584_v50 = vmul.f32 0.0033333334, %v1583_v51 }
 0x285   :  { %1585 = vst.msk [vmem:[#allocation2] sm:$0x1] %vm54_vm2, %v1584_v50 }
 0x286   :  { %2096 = shalt.err (!%p2093_p4)
}
 0x287   :  { %s2097_s21 = scalar_lea.hbm %s2818_s4, 16 }
 0x288   :  { %p2098_p5 = scmp.ne.s32.totalorder %s2818_s4, %s2097_s21  ;;  %p2101_p6 = scmp.lt.u32.totalorder %s2097_s21, %s2818_s4 }
 0x28a   :  { %p2103_p7 = pnand %p2101_p6, %p2098_p5 }
 0x28c   :  { %2106 = shalt.err (!%p2103_p7)
}
 0x28d   :  { %1595 = dma.vmem_to_hbm [thread:$0]  %s1593_s16, 16, %s2818_s4, [#allocation3]  }
 0x28e   :  { %2107 = dma.done.wait [#allocation3], 16  }
 0x28f   :  { %2108 = vsyncadd [#allocation3], 4294967280 }
 0x290   :  { %1599 = vsyncpa [#allocation3], 1 }

</bundles_post_ra>
